<compile_context>
chip_gen: v7x
topology: tpu7x:2x2x1
jax: 0.10.0
libtpu: 0.0.40
codegen_flags: <defaults>
</compile_context>

<pallas_src>
import functools

import jax
import jax.numpy as jnp
from jax.experimental import pallas as pl
from jax.experimental.pallas import tpu as pltpu

LANE = 128
SUBLANE = 8


def attention_lstm_kernel(x_ref, wih_ref, whh_ref, b_ref, wl_ref, bl_ref,
                          o_ref, xproj_ref, *, seq):
    # x_ref:     (seq*TB, E)    bf16, one batch tile, rows ordered (t, b)
    # wih_ref:   (E, 4*Hp)      bf16, gate-padded + pre-scaled input->gates weights
    # whh_ref:   (Hp, 4*Hp)     bf16, gate-padded + pre-scaled hidden->gates weights
    # b_ref:     (1, 4*Hp)      f32,  gate-padded + pre-scaled (b_ih + b_hh)
    # wl_ref:    (Hp, Op)       bf16, padded label weights
    # bl_ref:    (1, Op)        f32,  padded label bias
    # o_ref:     (TB, Op)       f32,  lane-dense logits block
    # xproj_ref: (seq*TB, 4*Hp) VMEM scratch for the hoisted input projection
    SB, _ = x_ref.shape
    TB = SB // seq
    Hp = whh_ref.shape[0]

    # ---- Hoisted + FUSED input projection: one (seq*TB, E) x (E, 4Hp) matmul with
    # the bias folded into its epilogue, stored with one contiguous unmasked store.
    # Entirely off the h->h critical path, so it pipelines against the recurrence.
    xproj = jnp.dot(x_ref[...], wih_ref[...],
                    preferred_element_type=jnp.float32) + b_ref[...]
    xproj_ref[...] = xproj.astype(xproj_ref.dtype)

    # Hidden->gate weights kept resident as a value across the unrolled loop.
    # NOTE: if a bundle dump at larger Hp ever shows spills, feed whh_ref[...]
    # directly into the per-step dot and let Mosaic stream it from VMEM.
    whh = whh_ref[...]

    # ---- LSTM recurrence, fully unrolled (seq is a small static trip count).
    # TODO(synk): at production seq lengths switch to lax.fori_loop with an
    # (seq*TB, Hp) VMEM h-slab (bounded vreg pressure) and run the attention
    # scores / weighted sum below as two matmuls against that slab.
    h = jnp.zeros((TB, Hp), jnp.float32)
    c = jnp.zeros((TB, Hp), jnp.float32)
    hs = []
    for t in range(seq):
        gates = (xproj_ref[pl.ds(t * TB, TB), :].astype(jnp.float32)
                 + jnp.dot(h.astype(jnp.bfloat16), whh,
                           preferred_element_type=jnp.float32))
        # i/f/o pre-activations were pre-scaled by 0.5 in the wrapper, so
        # sigmoid(z) == 0.5 * (tanh(z/2) + 1) turns all four gates into ONE tanh.
        tg = jnp.tanh(gates)
        i_g = 0.5 * (tg[:, 0 * Hp:1 * Hp] + 1.0)   # lane-aligned full-vreg slices
        f_g = 0.5 * (tg[:, 1 * Hp:2 * Hp] + 1.0)
        g_g = tg[:, 2 * Hp:3 * Hp]
        o_g = 0.5 * (tg[:, 3 * Hp:4 * Hp] + 1.0)
        c = f_g * c + i_g * g_g
        h = o_g * jnp.tanh(c)
        hs.append(h)                                # stays in vregs at this size

    # ---- attention over time against the final hidden state (VPU/XLU; a handful
    # of ops at this seq/H -- see TODO above for the MXU formulation at scale).
    h_final = hs[-1]
    scores = [jnp.sum(h_t * h_final, axis=-1, keepdims=True) for h_t in hs]  # (TB,1)
    m = scores[0]
    for s_t in scores[1:]:
        m = jnp.maximum(m, s_t)
    exps = [jnp.exp(s_t - m) for s_t in scores]
    denom = exps[0]
    for e_t in exps[1:]:
        denom = denom + e_t
    inv = pl.reciprocal(denom, approx=True)         # EUP slot, off the VPU
    new_h = hs[0] * (exps[0] * inv)
    for t in range(1, seq):
        new_h = new_h + hs[t] * (exps[t] * inv)

    # ---- final linear into a lane-dense (TB, Op) block (full unmasked stores).
    o_ref[...] = (jnp.dot(new_h.astype(jnp.bfloat16), wl_ref[...],
                          preferred_element_type=jnp.float32)
                  + bl_ref[...]).astype(o_ref.dtype)


def attention_model_forward(x_emb_tm, w_ih, w_hh, b_ih, b_hh, w_label, b_label):
    """x_emb_tm: (seq, batch, embed) f32 embedded input, time-major (== permute(1,0,2)).
    w_ih: (4H, E), w_hh: (4H, H), b_ih/b_hh: (4H,), w_label: (O, H), b_label: (O,).
    Returns logits of shape (batch, O) in f32."""
    seq, B, E = x_emb_tm.shape
    H = w_hh.shape[1]
    O = w_label.shape[0]

    Hp = ((H + LANE - 1) // LANE) * LANE          # pad hidden so each gate is lane-aligned
    Op = ((O + LANE - 1) // LANE) * LANE          # lane-dense output block
    # Batch tile: as large as the batch allows (up to 128) so the recurrence matmul
    # fills the MXU M dimension; padded rows ride along nearly free (latency-bound).
    tile_b = min(128, ((B + SUBLANE - 1) // SUBLANE) * SUBLANE)
    Bp = ((B + tile_b - 1) // tile_b) * tile_b
    n_btiles = Bp // tile_b
    # NOTE(v7x): at real batch sizes keep n_btiles a multiple of 2 so the "parallel"
    # grid axis can occupy both TensorCores; at batch=2 it degenerates to one tile.

    # Per-gate padded + transposed weights, with the 0.5 pre-scale for the i/f/o
    # gates (sigmoid-via-tanh trick) folded directly into weights and biases.
    gate_scale = (0.5, 0.5, 1.0, 0.5)             # PyTorch LSTM gate order: i, f, g, o

    def prep_gate_mat(wt, rows):
        # wt: (4H, K) -> (rows, 4*Hp) transposed, zero-padded, gate-scaled.
        K = wt.shape[1]
        out = jnp.zeros((rows, 4 * Hp), jnp.float32)
        for g in range(4):
            blk = wt[g * H:(g + 1) * H, :].T * gate_scale[g]   # (K, H)
            out = out.at[:K, g * Hp:g * Hp + H].set(blk)
        return out

    wih_p = prep_gate_mat(w_ih, E).astype(jnp.bfloat16)        # (E, 4Hp)
    whh_p = prep_gate_mat(w_hh, Hp).astype(jnp.bfloat16)       # (Hp, 4Hp)

    bsum = b_ih + b_hh
    b_p = jnp.zeros((1, 4 * Hp), jnp.float32)
    for g in range(4):
        b_p = b_p.at[0, g * Hp:g * Hp + H].set(bsum[g * H:(g + 1) * H] * gate_scale[g])

    wl_p = jnp.zeros((Hp, Op), jnp.float32).at[:H, :O].set(w_label.T).astype(jnp.bfloat16)
    bl_p = jnp.zeros((1, Op), jnp.float32).at[:, :O].set(b_label[None, :])

    # (seq, Bp, E) -> (n_btiles, seq*tile_b, E): each grid step gets one sublane-dense
    # 2-D slab so the in-kernel input projection is a SINGLE matmul.
    x_p = jnp.zeros((seq, Bp, E), jnp.float32).at[:, :B, :].set(x_emb_tm)
    x_p = x_p.astype(jnp.bfloat16)
    x_p = (x_p.reshape(seq, n_btiles, tile_b, E)
               .transpose(1, 0, 2, 3)
               .reshape(n_btiles, seq * tile_b, E))

    # xproj scratch: exact f32 while small; bf16 once the slab is big enough to
    # threaten VMEM (v7x: 64 MiB physical / 32 MiB scoped default) -- halves both
    # footprint and scratch store/load traffic.
    xproj_f32_bytes = seq * tile_b * 4 * Hp * 4
    xproj_dtype = jnp.float32 if xproj_f32_bytes <= (8 << 20) else jnp.bfloat16

    def _nbytes(shape, dt):
        n = 1
        for d in shape:
            n *= d
        return n * jnp.dtype(dt).itemsize

    vmem_need = (
        2 * _nbytes((seq * tile_b, E), jnp.bfloat16)       # x, double-buffered
        + 2 * _nbytes((E, 4 * Hp), jnp.bfloat16)
        + 2 * _nbytes((Hp, 4 * Hp), jnp.bfloat16)
        + 2 * _nbytes((1, 4 * Hp), jnp.float32)
        + 2 * _nbytes((Hp, Op), jnp.bfloat16)
        + 2 * _nbytes((1, Op), jnp.float32)
        + 2 * _nbytes((tile_b, Op), jnp.float32)
        + _nbytes((seq * tile_b, 4 * Hp), xproj_dtype))
    vmem_limit = int(min(max(2 * vmem_need, 8 << 20), 32 << 20))  # headroom, safe on all chips

    kernel = functools.partial(attention_lstm_kernel, seq=seq)
    out = pl.pallas_call(
        kernel,
        out_shape=jax.ShapeDtypeStruct((Bp, Op), jnp.float32),
        grid_spec=pltpu.PrefetchScalarGridSpec(
            num_scalar_prefetch=0,
            grid=(n_btiles,),
            in_specs=[
                pl.BlockSpec((None, seq * tile_b, E), lambda i: (i, 0, 0)),
                pl.BlockSpec((E, 4 * Hp), lambda i: (0, 0)),
                pl.BlockSpec((Hp, 4 * Hp), lambda i: (0, 0)),
                pl.BlockSpec((1, 4 * Hp), lambda i: (0, 0)),
                pl.BlockSpec((Hp, Op), lambda i: (0, 0)),
                pl.BlockSpec((1, Op), lambda i: (0, 0)),
            ],
            out_specs=pl.BlockSpec((tile_b, Op), lambda i: (i, 0)),
            scratch_shapes=[pltpu.VMEM((seq * tile_b, 4 * Hp), xproj_dtype)],
        ),
        compiler_params=pltpu.CompilerParams(
            dimension_semantics=("parallel",),
            vmem_limit_bytes=vmem_limit),
    )(x_p, wih_p, whh_p, b_p, wl_p, bl_p)
    return out[:B, :O]


def reference_forward(x_emb_tm, w_ih, w_hh, b_ih, b_hh, w_label, b_label):
    """Pure-JAX f32 reference replicating the PyTorch forward semantics."""
    seq, B, E = x_emb_tm.shape
    H = w_hh.shape[1]
    wih_t, whh_t = w_ih.T, w_hh.T
    b = (b_ih + b_hh)[None, :]
    h = jnp.zeros((B, H), jnp.float32)
    c = jnp.zeros((B, H), jnp.float32)
    outs = []
    for t in range(seq):
        gates = x_emb_tm[t] @ wih_t + h @ whh_t + b
        i_g = jax.nn.sigmoid(gates[:, 0 * H:1 * H])
        f_g = jax.nn.sigmoid(gates[:, 1 * H:2 * H])
        g_g = jnp.tanh(gates[:, 2 * H:3 * H])
        o_g = jax.nn.sigmoid(gates[:, 3 * H:4 * H])
        c = f_g * c + i_g * g_g
        h = o_g * jnp.tanh(c)
        outs.append(h)
    lstm_out = jnp.stack(outs, axis=0)                  # (seq, B, H)
    scores = jnp.einsum('tbh,bh->bt', lstm_out, h)      # (B, seq)
    soft = jax.nn.softmax(scores, axis=1)
    new_h = jnp.einsum('tbh,bt->bh', lstm_out, soft)    # (B, H)
    return new_h @ w_label.T + b_label[None, :]


if __name__ == "__main__":
    batch_size = 2
    seq_len = 8
    vocab_size = 50
    embedding_length = 32
    hidden_size = 32
    output_size = 2

    key = jax.random.PRNGKey(0)
    k_emb, k_wih, k_whh, k_bih, k_bhh, k_wl, k_bl, k_tok = jax.random.split(key, 8)

    bound = 1.0 / jnp.sqrt(hidden_size)
    emb_table = jax.random.normal(k_emb, (vocab_size, embedding_length), jnp.float32)
    w_ih = jax.random.uniform(k_wih, (4 * hidden_size, embedding_length),
                              jnp.float32, -bound, bound)
    w_hh = jax.random.uniform(k_whh, (4 * hidden_size, hidden_size),
                              jnp.float32, -bound, bound)
    b_ih = jax.random.uniform(k_bih, (4 * hidden_size,), jnp.float32, -bound, bound)
    b_hh = jax.random.uniform(k_bhh, (4 * hidden_size,), jnp.float32, -bound, bound)
    w_label = jax.random.uniform(k_wl, (output_size, hidden_size),
                                 jnp.float32, -bound, bound)
    b_label = jax.random.uniform(k_bl, (output_size,), jnp.float32, -bound, bound)

    input_sentences = jax.random.randint(k_tok, (batch_size, seq_len), 0, vocab_size)

    # TODO(synk): embedding gather stays in plain JAX; arbitrary-index gather has no
    #             clean rectangular BlockSpec equivalent on TPU Pallas.
    x_emb = emb_table[input_sentences]                    # (B, seq, E)
    x_emb_tm = jnp.transpose(x_emb, (1, 0, 2))            # (seq, B, E) == permute(1,0,2)

    logits = attention_model_forward(x_emb_tm, w_ih, w_hh, b_ih, b_hh, w_label, b_label)
    logits = jax.block_until_ready(logits)
    assert logits.shape == (batch_size, output_size)

    # Reference computed in f32 with the matmul operands rounded through bf16
    # (the kernel runs its matmuls in bf16 with f32 accumulation).
    rt = lambda a: a.astype(jnp.bfloat16).astype(jnp.float32)
    ref = reference_forward(rt(x_emb_tm), rt(w_ih), rt(w_hh), b_ih, b_hh,
                            rt(w_label), b_label)
    assert jnp.allclose(logits, ref, atol=1e-2, rtol=1e-2), (logits, ref)

    print("KERNEL_OK")
</pallas_src>

<mosaic_0001>
module attributes {stable_mosaic.version = 11 : i64} {
  func.func @attention_lstm_kernel(%arg0: i32, %arg1: memref<1x64x32xbf16, #tpu.memory_space<vmem>>, %arg2: memref<32x512xbf16, #tpu.memory_space<vmem>>, %arg3: memref<128x512xbf16, #tpu.memory_space<vmem>>, %arg4: memref<1x512xf32, #tpu.memory_space<vmem>>, %arg5: memref<128x128xbf16, #tpu.memory_space<vmem>>, %arg6: memref<1x128xf32, #tpu.memory_space<vmem>>, %arg7: memref<8x128xf32, #tpu.memory_space<vmem>>, %arg8: memref<64x512xf32, #tpu.memory_space<vmem>>) attributes {dimension_semantics = [#tpu.dimension_semantics<parallel>], iteration_bounds = array<i64: 1>, scalar_prefetch = 0 : i64, scratch_operands = 1 : i64, tpu.core_type = #tpu.core_type<tc>, window_params = [{transform_indices = @transform_0, window_bounds = array<i64: 1, 64, 32>}, {pipeline_mode = #tpu.pipeline_mode<synchronous>, transform_indices = @transform_1, window_bounds = array<i64: 32, 512>}, {pipeline_mode = #tpu.pipeline_mode<synchronous>, transform_indices = @transform_2, window_bounds = array<i64: 128, 512>}, {pipeline_mode = #tpu.pipeline_mode<synchronous>, transform_indices = @transform_3, window_bounds = array<i64: 1, 512>}, {pipeline_mode = #tpu.pipeline_mode<synchronous>, transform_indices = @transform_4, window_bounds = array<i64: 128, 128>}, {pipeline_mode = #tpu.pipeline_mode<synchronous>, transform_indices = @transform_5, window_bounds = array<i64: 1, 128>}, {transform_indices = @transform_6, window_bounds = array<i64: 8, 128>}]} {
    %c0 = arith.constant 0 : index
    %c0_0 = arith.constant 0 : index
    %c0_1 = arith.constant 0 : index
    %0 = vector.load %arg1[%c0, %c0_0, %c0_1] : memref<1x64x32xbf16, #tpu.memory_space<vmem>>, vector<1x64x32xbf16>
    %1 = vector.shape_cast %0 : vector<1x64x32xbf16> to vector<64x32xbf16>
    %c0_2 = arith.constant 0 : index
    %c0_3 = arith.constant 0 : index
    %2 = vector.load %arg2[%c0_2, %c0_3] : memref<32x512xbf16, #tpu.memory_space<vmem>>, vector<32x512xbf16>
    %cst = arith.constant dense<0.000000e+00> : vector<64x512xf32>
    %3 = tpu.matmul %1, %2, %cst {dimension_numbers = #tpu.dot_dimension_numbers<[1], [0], [0], [1], [0, 0, 1, 1], [], []>} : vector<64x32xbf16>, vector<32x512xbf16>, vector<64x512xf32> -> vector<64x512xf32>
    %c0_4 = arith.constant 0 : index
    %c0_5 = arith.constant 0 : index
    %4 = vector.load %arg4[%c0_4, %c0_5] : memref<1x512xf32, #tpu.memory_space<vmem>>, vector<1x512xf32>
    %5 = vector.broadcast %4 : vector<1x512xf32> to vector<64x512xf32>
    %6 = arith.addf %3, %5 : vector<64x512xf32>
    %c0_6 = arith.constant 0 : index
    %c0_7 = arith.constant 0 : index
    %7 = vector.load %arg8[%c0_6, %c0_7] : memref<64x512xf32, #tpu.memory_space<vmem>>, vector<64x512xf32>
    tpu.vector_store %arg8[%c0_6, %c0_7], %6 {strides = array<i32>} : memref<64x512xf32, #tpu.memory_space<vmem>>, vector<64x512xf32>,
    %c0_8 = arith.constant 0 : index
    %c0_9 = arith.constant 0 : index
    %8 = vector.load %arg3[%c0_8, %c0_9] : memref<128x512xbf16, #tpu.memory_space<vmem>>, vector<128x512xbf16>
    %cst_10 = arith.constant 0.000000e+00 : f32
    %9 = vector.broadcast %cst_10 : f32 to vector<8x128xf32>
    %cst_11 = arith.constant 0.000000e+00 : f32
    %10 = vector.broadcast %cst_11 : f32 to vector<8x128xf32>
    %c0_12 = arith.constant 0 : index
    %c0_13 = arith.constant 0 : index
    %11 = vector.load %arg8[%c0_12, %c0_13] : memref<64x512xf32, #tpu.memory_space<vmem>>, vector<8x512xf32>
    %12 = arith.truncf %9 : vector<8x128xf32> to vector<8x128xbf16>
    %cst_14 = arith.constant dense<0.000000e+00> : vector<8x512xf32>
    %13 = tpu.matmul %12, %8, %cst_14 {dimension_numbers = #tpu.dot_dimension_numbers<[1], [0], [0], [1], [0, 0, 1, 1], [], []>} : vector<8x128xbf16>, vector<128x512xbf16>, vector<8x512xf32> -> vector<8x512xf32>
    %14 = arith.addf %11, %13 : vector<8x512xf32>
    %15 = math.tanh %14 : vector<8x512xf32>
    %16 = vector.extract_strided_slice %15 {offsets = [0, 0], sizes = [8, 128], strides = [1, 1]} : vector<8x512xf32> to vector<8x128xf32>
    %cst_15 = arith.constant 1.000000e+00 : f32
    %17 = vector.broadcast %cst_15 : f32 to vector<8x128xf32>
    %18 = arith.addf %16, %17 : vector<8x128xf32>
    %cst_16 = arith.constant 5.000000e-01 : f32
    %19 = vector.broadcast %cst_16 : f32 to vector<8x128xf32>
    %20 = arith.mulf %19, %18 : vector<8x128xf32>
    %21 = vector.extract_strided_slice %15 {offsets = [0, 128], sizes = [8, 128], strides = [1, 1]} : vector<8x512xf32> to vector<8x128xf32>
    %cst_17 = arith.constant 1.000000e+00 : f32
    %22 = vector.broadcast %cst_17 : f32 to vector<8x128xf32>
    %23 = arith.addf %21, %22 : vector<8x128xf32>
    %cst_18 = arith.constant 5.000000e-01 : f32
    %24 = vector.broadcast %cst_18 : f32 to vector<8x128xf32>
    %25 = arith.mulf %24, %23 : vector<8x128xf32>
    %26 = vector.extract_strided_slice %15 {offsets = [0, 256], sizes = [8, 128], strides = [1, 1]} : vector<8x512xf32> to vector<8x128xf32>
    %27 = vector.extract_strided_slice %15 {offsets = [0, 384], sizes = [8, 128], strides = [1, 1]} : vector<8x512xf32> to vector<8x128xf32>
    %cst_19 = arith.constant 1.000000e+00 : f32
    %28 = vector.broadcast %cst_19 : f32 to vector<8x128xf32>
    %29 = arith.addf %27, %28 : vector<8x128xf32>
    %cst_20 = arith.constant 5.000000e-01 : f32
    %30 = vector.broadcast %cst_20 : f32 to vector<8x128xf32>
    %31 = arith.mulf %30, %29 : vector<8x128xf32>
    %32 = arith.mulf %25, %10 : vector<8x128xf32>
    %33 = arith.mulf %20, %26 : vector<8x128xf32>
    %34 = arith.addf %32, %33 : vector<8x128xf32>
    %35 = math.tanh %34 : vector<8x128xf32>
    %36 = arith.mulf %31, %35 : vector<8x128xf32>
    %c8 = arith.constant 8 : index
    %c0_21 = arith.constant 0 : index
    %37 = vector.load %arg8[%c8, %c0_21] : memref<64x512xf32, #tpu.memory_space<vmem>>, vector<8x512xf32>
    %38 = arith.truncf %36 : vector<8x128xf32> to vector<8x128xbf16>
    %cst_22 = arith.constant dense<0.000000e+00> : vector<8x512xf32>
    %39 = tpu.matmul %38, %8, %cst_22 {dimension_numbers = #tpu.dot_dimension_numbers<[1], [0], [0], [1], [0, 0, 1, 1], [], []>} : vector<8x128xbf16>, vector<128x512xbf16>, vector<8x512xf32> -> vector<8x512xf32>
    %40 = arith.addf %37, %39 : vector<8x512xf32>
    %41 = math.tanh %40 : vector<8x512xf32>
    %42 = vector.extract_strided_slice %41 {offsets = [0, 0], sizes = [8, 128], strides = [1, 1]} : vector<8x512xf32> to vector<8x128xf32>
    %cst_23 = arith.constant 1.000000e+00 : f32
    %43 = vector.broadcast %cst_23 : f32 to vector<8x128xf32>
    %44 = arith.addf %42, %43 : vector<8x128xf32>
    %cst_24 = arith.constant 5.000000e-01 : f32
    %45 = vector.broadcast %cst_24 : f32 to vector<8x128xf32>
    %46 = arith.mulf %45, %44 : vector<8x128xf32>
    %47 = vector.extract_strided_slice %41 {offsets = [0, 128], sizes = [8, 128], strides = [1, 1]} : vector<8x512xf32> to vector<8x128xf32>
    %cst_25 = arith.constant 1.000000e+00 : f32
    %48 = vector.broadcast %cst_25 : f32 to vector<8x128xf32>
    %49 = arith.addf %47, %48 : vector<8x128xf32>
    %cst_26 = arith.constant 5.000000e-01 : f32
    %50 = vector.broadcast %cst_26 : f32 to vector<8x128xf32>
    %51 = arith.mulf %50, %49 : vector<8x128xf32>
    %52 = vector.extract_strided_slice %41 {offsets = [0, 256], sizes = [8, 128], strides = [1, 1]} : vector<8x512xf32> to vector<8x128xf32>
    %53 = vector.extract_strided_slice %41 {offsets = [0, 384], sizes = [8, 128], strides = [1, 1]} : vector<8x512xf32> to vector<8x128xf32>
    %cst_27 = arith.constant 1.000000e+00 : f32
    %54 = vector.broadcast %cst_27 : f32 to vector<8x128xf32>
    %55 = arith.addf %53, %54 : vector<8x128xf32>
    %cst_28 = arith.constant 5.000000e-01 : f32
    %56 = vector.broadcast %cst_28 : f32 to vector<8x128xf32>
    %57 = arith.mulf %56, %55 : vector<8x128xf32>
    %58 = arith.mulf %51, %34 : vector<8x128xf32>
    %59 = arith.mulf %46, %52 : vector<8x128xf32>
    %60 = arith.addf %58, %59 : vector<8x128xf32>
    %61 = math.tanh %60 : vector<8x128xf32>
    %62 = arith.mulf %57, %61 : vector<8x128xf32>
    %c16 = arith.constant 16 : index
    %c0_29 = arith.constant 0 : index
    %63 = vector.load %arg8[%c16, %c0_29] : memref<64x512xf32, #tpu.memory_space<vmem>>, vector<8x512xf32>
    %64 = arith.truncf %62 : vector<8x128xf32> to vector<8x128xbf16>
    %cst_30 = arith.constant dense<0.000000e+00> : vector<8x512xf32>
    %65 = tpu.matmul %64, %8, %cst_30 {dimension_numbers = #tpu.dot_dimension_numbers<[1], [0], [0], [1], [0, 0, 1, 1], [], []>} : vector<8x128xbf16>, vector<128x512xbf16>, vector<8x512xf32> -> vector<8x512xf32>
    %66 = arith.addf %63, %65 : vector<8x512xf32>
    %67 = math.tanh %66 : vector<8x512xf32>
    %68 = vector.extract_strided_slice %67 {offsets = [0, 0], sizes = [8, 128], strides = [1, 1]} : vector<8x512xf32> to vector<8x128xf32>
    %cst_31 = arith.constant 1.000000e+00 : f32
    %69 = vector.broadcast %cst_31 : f32 to vector<8x128xf32>
    %70 = arith.addf %68, %69 : vector<8x128xf32>
    %cst_32 = arith.constant 5.000000e-01 : f32
    %71 = vector.broadcast %cst_32 : f32 to vector<8x128xf32>
    %72 = arith.mulf %71, %70 : vector<8x128xf32>
    %73 = vector.extract_strided_slice %67 {offsets = [0, 128], sizes = [8, 128], strides = [1, 1]} : vector<8x512xf32> to vector<8x128xf32>
    %cst_33 = arith.constant 1.000000e+00 : f32
    %74 = vector.broadcast %cst_33 : f32 to vector<8x128xf32>
    %75 = arith.addf %73, %74 : vector<8x128xf32>
    %cst_34 = arith.constant 5.000000e-01 : f32
    %76 = vector.broadcast %cst_34 : f32 to vector<8x128xf32>
    %77 = arith.mulf %76, %75 : vector<8x128xf32>
    %78 = vector.extract_strided_slice %67 {offsets = [0, 256], sizes = [8, 128], strides = [1, 1]} : vector<8x512xf32> to vector<8x128xf32>
    %79 = vector.extract_strided_slice %67 {offsets = [0, 384], sizes = [8, 128], strides = [1, 1]} : vector<8x512xf32> to vector<8x128xf32>
    %cst_35 = arith.constant 1.000000e+00 : f32
    %80 = vector.broadcast %cst_35 : f32 to vector<8x128xf32>
    %81 = arith.addf %79, %80 : vector<8x128xf32>
    %cst_36 = arith.constant 5.000000e-01 : f32
    %82 = vector.broadcast %cst_36 : f32 to vector<8x128xf32>
    %83 = arith.mulf %82, %81 : vector<8x128xf32>
    %84 = arith.mulf %77, %60 : vector<8x128xf32>
    %85 = arith.mulf %72, %78 : vector<8x128xf32>
    %86 = arith.addf %84, %85 : vector<8x128xf32>
    %87 = math.tanh %86 : vector<8x128xf32>
    %88 = arith.mulf %83, %87 : vector<8x128xf32>
    %c24 = arith.constant 24 : index
    %c0_37 = arith.constant 0 : index
    %89 = vector.load %arg8[%c24, %c0_37] : memref<64x512xf32, #tpu.memory_space<vmem>>, vector<8x512xf32>
    %90 = arith.truncf %88 : vector<8x128xf32> to vector<8x128xbf16>
    %cst_38 = arith.constant dense<0.000000e+00> : vector<8x512xf32>
    %91 = tpu.matmul %90, %8, %cst_38 {dimension_numbers = #tpu.dot_dimension_numbers<[1], [0], [0], [1], [0, 0, 1, 1], [], []>} : vector<8x128xbf16>, vector<128x512xbf16>, vector<8x512xf32> -> vector<8x512xf32>
    %92 = arith.addf %89, %91 : vector<8x512xf32>
    %93 = math.tanh %92 : vector<8x512xf32>
    %94 = vector.extract_strided_slice %93 {offsets = [0, 0], sizes = [8, 128], strides = [1, 1]} : vector<8x512xf32> to vector<8x128xf32>
    %cst_39 = arith.constant 1.000000e+00 : f32
    %95 = vector.broadcast %cst_39 : f32 to vector<8x128xf32>
    %96 = arith.addf %94, %95 : vector<8x128xf32>
    %cst_40 = arith.constant 5.000000e-01 : f32
    %97 = vector.broadcast %cst_40 : f32 to vector<8x128xf32>
    %98 = arith.mulf %97, %96 : vector<8x128xf32>
    %99 = vector.extract_strided_slice %93 {offsets = [0, 128], sizes = [8, 128], strides = [1, 1]} : vector<8x512xf32> to vector<8x128xf32>
    %cst_41 = arith.constant 1.000000e+00 : f32
    %100 = vector.broadcast %cst_41 : f32 to vector<8x128xf32>
    %101 = arith.addf %99, %100 : vector<8x128xf32>
    %cst_42 = arith.constant 5.000000e-01 : f32
    %102 = vector.broadcast %cst_42 : f32 to vector<8x128xf32>
    %103 = arith.mulf %102, %101 : vector<8x128xf32>
    %104 = vector.extract_strided_slice %93 {offsets = [0, 256], sizes = [8, 128], strides = [1, 1]} : vector<8x512xf32> to vector<8x128xf32>
    %105 = vector.extract_strided_slice %93 {offsets = [0, 384], sizes = [8, 128], strides = [1, 1]} : vector<8x512xf32> to vector<8x128xf32>
    %cst_43 = arith.constant 1.000000e+00 : f32
    %106 = vector.broadcast %cst_43 : f32 to vector<8x128xf32>
    %107 = arith.addf %105, %106 : vector<8x128xf32>
    %cst_44 = arith.constant 5.000000e-01 : f32
    %108 = vector.broadcast %cst_44 : f32 to vector<8x128xf32>
    %109 = arith.mulf %108, %107 : vector<8x128xf32>
    %110 = arith.mulf %103, %86 : vector<8x128xf32>
    %111 = arith.mulf %98, %104 : vector<8x128xf32>
    %112 = arith.addf %110, %111 : vector<8x128xf32>
    %113 = math.tanh %112 : vector<8x128xf32>
    %114 = arith.mulf %109, %113 : vector<8x128xf32>
    %c32 = arith.constant 32 : index
    %c0_45 = arith.constant 0 : index
    %115 = vector.load %arg8[%c32, %c0_45] : memref<64x512xf32, #tpu.memory_space<vmem>>, vector<8x512xf32>
    %116 = arith.truncf %114 : vector<8x128xf32> to vector<8x128xbf16>
    %cst_46 = arith.constant dense<0.000000e+00> : vector<8x512xf32>
    %117 = tpu.matmul %116, %8, %cst_46 {dimension_numbers = #tpu.dot_dimension_numbers<[1], [0], [0], [1], [0, 0, 1, 1], [], []>} : vector<8x128xbf16>, vector<128x512xbf16>, vector<8x512xf32> -> vector<8x512xf32>
    %118 = arith.addf %115, %117 : vector<8x512xf32>
    %119 = math.tanh %118 : vector<8x512xf32>
    %120 = vector.extract_strided_slice %119 {offsets = [0, 0], sizes = [8, 128], strides = [1, 1]} : vector<8x512xf32> to vector<8x128xf32>
    %cst_47 = arith.constant 1.000000e+00 : f32
    %121 = vector.broadcast %cst_47 : f32 to vector<8x128xf32>
    %122 = arith.addf %120, %121 : vector<8x128xf32>
    %cst_48 = arith.constant 5.000000e-01 : f32
    %123 = vector.broadcast %cst_48 : f32 to vector<8x128xf32>
    %124 = arith.mulf %123, %122 : vector<8x128xf32>
    %125 = vector.extract_strided_slice %119 {offsets = [0, 128], sizes = [8, 128], strides = [1, 1]} : vector<8x512xf32> to vector<8x128xf32>
    %cst_49 = arith.constant 1.000000e+00 : f32
    %126 = vector.broadcast %cst_49 : f32 to vector<8x128xf32>
    %127 = arith.addf %125, %126 : vector<8x128xf32>
    %cst_50 = arith.constant 5.000000e-01 : f32
    %128 = vector.broadcast %cst_50 : f32 to vector<8x128xf32>
    %129 = arith.mulf %128, %127 : vector<8x128xf32>
    %130 = vector.extract_strided_slice %119 {offsets = [0, 256], sizes = [8, 128], strides = [1, 1]} : vector<8x512xf32> to vector<8x128xf32>
    %131 = vector.extract_strided_slice %119 {offsets = [0, 384], sizes = [8, 128], strides = [1, 1]} : vector<8x512xf32> to vector<8x128xf32>
    %cst_51 = arith.constant 1.000000e+00 : f32
    %132 = vector.broadcast %cst_51 : f32 to vector<8x128xf32>
    %133 = arith.addf %131, %132 : vector<8x128xf32>
    %cst_52 = arith.constant 5.000000e-01 : f32
    %134 = vector.broadcast %cst_52 : f32 to vector<8x128xf32>
    %135 = arith.mulf %134, %133 : vector<8x128xf32>
    %136 = arith.mulf %129, %112 : vector<8x128xf32>
    %137 = arith.mulf %124, %130 : vector<8x128xf32>
    %138 = arith.addf %136, %137 : vector<8x128xf32>
    %139 = math.tanh %138 : vector<8x128xf32>
    %140 = arith.mulf %135, %139 : vector<8x128xf32>
    %c40 = arith.constant 40 : index
    %c0_53 = arith.constant 0 : index
    %141 = vector.load %arg8[%c40, %c0_53] : memref<64x512xf32, #tpu.memory_space<vmem>>, vector<8x512xf32>
    %142 = arith.truncf %140 : vector<8x128xf32> to vector<8x128xbf16>
    %cst_54 = arith.constant dense<0.000000e+00> : vector<8x512xf32>
    %143 = tpu.matmul %142, %8, %cst_54 {dimension_numbers = #tpu.dot_dimension_numbers<[1], [0], [0], [1], [0, 0, 1, 1], [], []>} : vector<8x128xbf16>, vector<128x512xbf16>, vector<8x512xf32> -> vector<8x512xf32>
    %144 = arith.addf %141, %143 : vector<8x512xf32>
    %145 = math.tanh %144 : vector<8x512xf32>
    %146 = vector.extract_strided_slice %145 {offsets = [0, 0], sizes = [8, 128], strides = [1, 1]} : vector<8x512xf32> to vector<8x128xf32>
    %cst_55 = arith.constant 1.000000e+00 : f32
    %147 = vector.broadcast %cst_55 : f32 to vector<8x128xf32>
    %148 = arith.addf %146, %147 : vector<8x128xf32>
    %cst_56 = arith.constant 5.000000e-01 : f32
    %149 = vector.broadcast %cst_56 : f32 to vector<8x128xf32>
    %150 = arith.mulf %149, %148 : vector<8x128xf32>
    %151 = vector.extract_strided_slice %145 {offsets = [0, 128], sizes = [8, 128], strides = [1, 1]} : vector<8x512xf32> to vector<8x128xf32>
    %cst_57 = arith.constant 1.000000e+00 : f32
    %152 = vector.broadcast %cst_57 : f32 to vector<8x128xf32>
    %153 = arith.addf %151, %152 : vector<8x128xf32>
    %cst_58 = arith.constant 5.000000e-01 : f32
    %154 = vector.broadcast %cst_58 : f32 to vector<8x128xf32>
    %155 = arith.mulf %154, %153 : vector<8x128xf32>
    %156 = vector.extract_strided_slice %145 {offsets = [0, 256], sizes = [8, 128], strides = [1, 1]} : vector<8x512xf32> to vector<8x128xf32>
    %157 = vector.extract_strided_slice %145 {offsets = [0, 384], sizes = [8, 128], strides = [1, 1]} : vector<8x512xf32> to vector<8x128xf32>
    %cst_59 = arith.constant 1.000000e+00 : f32
    %158 = vector.broadcast %cst_59 : f32 to vector<8x128xf32>
    %159 = arith.addf %157, %158 : vector<8x128xf32>
    %cst_60 = arith.constant 5.000000e-01 : f32
    %160 = vector.broadcast %cst_60 : f32 to vector<8x128xf32>
    %161 = arith.mulf %160, %159 : vector<8x128xf32>
    %162 = arith.mulf %155, %138 : vector<8x128xf32>
    %163 = arith.mulf %150, %156 : vector<8x128xf32>
    %164 = arith.addf %162, %163 : vector<8x128xf32>
    %165 = math.tanh %164 : vector<8x128xf32>
    %166 = arith.mulf %161, %165 : vector<8x128xf32>
    %c48 = arith.constant 48 : index
    %c0_61 = arith.constant 0 : index
    %167 = vector.load %arg8[%c48, %c0_61] : memref<64x512xf32, #tpu.memory_space<vmem>>, vector<8x512xf32>
    %168 = arith.truncf %166 : vector<8x128xf32> to vector<8x128xbf16>
    %cst_62 = arith.constant dense<0.000000e+00> : vector<8x512xf32>
    %169 = tpu.matmul %168, %8, %cst_62 {dimension_numbers = #tpu.dot_dimension_numbers<[1], [0], [0], [1], [0, 0, 1, 1], [], []>} : vector<8x128xbf16>, vector<128x512xbf16>, vector<8x512xf32> -> vector<8x512xf32>
    %170 = arith.addf %167, %169 : vector<8x512xf32>
    %171 = math.tanh %170 : vector<8x512xf32>
    %172 = vector.extract_strided_slice %171 {offsets = [0, 0], sizes = [8, 128], strides = [1, 1]} : vector<8x512xf32> to vector<8x128xf32>
    %cst_63 = arith.constant 1.000000e+00 : f32
    %173 = vector.broadcast %cst_63 : f32 to vector<8x128xf32>
    %174 = arith.addf %172, %173 : vector<8x128xf32>
    %cst_64 = arith.constant 5.000000e-01 : f32
    %175 = vector.broadcast %cst_64 : f32 to vector<8x128xf32>
    %176 = arith.mulf %175, %174 : vector<8x128xf32>
    %177 = vector.extract_strided_slice %171 {offsets = [0, 128], sizes = [8, 128], strides = [1, 1]} : vector<8x512xf32> to vector<8x128xf32>
    %cst_65 = arith.constant 1.000000e+00 : f32
    %178 = vector.broadcast %cst_65 : f32 to vector<8x128xf32>
    %179 = arith.addf %177, %178 : vector<8x128xf32>
    %cst_66 = arith.constant 5.000000e-01 : f32
    %180 = vector.broadcast %cst_66 : f32 to vector<8x128xf32>
    %181 = arith.mulf %180, %179 : vector<8x128xf32>
    %182 = vector.extract_strided_slice %171 {offsets = [0, 256], sizes = [8, 128], strides = [1, 1]} : vector<8x512xf32> to vector<8x128xf32>
    %183 = vector.extract_strided_slice %171 {offsets = [0, 384], sizes = [8, 128], strides = [1, 1]} : vector<8x512xf32> to vector<8x128xf32>
    %cst_67 = arith.constant 1.000000e+00 : f32
    %184 = vector.broadcast %cst_67 : f32 to vector<8x128xf32>
    %185 = arith.addf %183, %184 : vector<8x128xf32>
    %cst_68 = arith.constant 5.000000e-01 : f32
    %186 = vector.broadcast %cst_68 : f32 to vector<8x128xf32>
    %187 = arith.mulf %186, %185 : vector<8x128xf32>
    %188 = arith.mulf %181, %164 : vector<8x128xf32>
    %189 = arith.mulf %176, %182 : vector<8x128xf32>
    %190 = arith.addf %188, %189 : vector<8x128xf32>
    %191 = math.tanh %190 : vector<8x128xf32>
    %192 = arith.mulf %187, %191 : vector<8x128xf32>
    %c56 = arith.constant 56 : index
    %c0_69 = arith.constant 0 : index
    %193 = vector.load %arg8[%c56, %c0_69] : memref<64x512xf32, #tpu.memory_space<vmem>>, vector<8x512xf32>
    %194 = arith.truncf %192 : vector<8x128xf32> to vector<8x128xbf16>
    %cst_70 = arith.constant dense<0.000000e+00> : vector<8x512xf32>
    %195 = tpu.matmul %194, %8, %cst_70 {dimension_numbers = #tpu.dot_dimension_numbers<[1], [0], [0], [1], [0, 0, 1, 1], [], []>} : vector<8x128xbf16>, vector<128x512xbf16>, vector<8x512xf32> -> vector<8x512xf32>
    %196 = arith.addf %193, %195 : vector<8x512xf32>
    %197 = math.tanh %196 : vector<8x512xf32>
    %198 = vector.extract_strided_slice %197 {offsets = [0, 0], sizes = [8, 128], strides = [1, 1]} : vector<8x512xf32> to vector<8x128xf32>
    %cst_71 = arith.constant 1.000000e+00 : f32
    %199 = vector.broadcast %cst_71 : f32 to vector<8x128xf32>
    %200 = arith.addf %198, %199 : vector<8x128xf32>
    %cst_72 = arith.constant 5.000000e-01 : f32
    %201 = vector.broadcast %cst_72 : f32 to vector<8x128xf32>
    %202 = arith.mulf %201, %200 : vector<8x128xf32>
    %203 = vector.extract_strided_slice %197 {offsets = [0, 128], sizes = [8, 128], strides = [1, 1]} : vector<8x512xf32> to vector<8x128xf32>
    %cst_73 = arith.constant 1.000000e+00 : f32
    %204 = vector.broadcast %cst_73 : f32 to vector<8x128xf32>
    %205 = arith.addf %203, %204 : vector<8x128xf32>
    %cst_74 = arith.constant 5.000000e-01 : f32
    %206 = vector.broadcast %cst_74 : f32 to vector<8x128xf32>
    %207 = arith.mulf %206, %205 : vector<8x128xf32>
    %208 = vector.extract_strided_slice %197 {offsets = [0, 256], sizes = [8, 128], strides = [1, 1]} : vector<8x512xf32> to vector<8x128xf32>
    %209 = vector.extract_strided_slice %197 {offsets = [0, 384], sizes = [8, 128], strides = [1, 1]} : vector<8x512xf32> to vector<8x128xf32>
    %cst_75 = arith.constant 1.000000e+00 : f32
    %210 = vector.broadcast %cst_75 : f32 to vector<8x128xf32>
    %211 = arith.addf %209, %210 : vector<8x128xf32>
    %cst_76 = arith.constant 5.000000e-01 : f32
    %212 = vector.broadcast %cst_76 : f32 to vector<8x128xf32>
    %213 = arith.mulf %212, %211 : vector<8x128xf32>
    %214 = arith.mulf %207, %190 : vector<8x128xf32>
    %215 = arith.mulf %202, %208 : vector<8x128xf32>
    %216 = arith.addf %214, %215 : vector<8x128xf32>
    %217 = math.tanh %216 : vector<8x128xf32>
    %218 = arith.mulf %213, %217 : vector<8x128xf32>
    %219 = arith.mulf %36, %218 : vector<8x128xf32>
    %cst_77 = arith.constant dense<0.000000e+00> : vector<8xf32>
    %220 = vector.multi_reduction <add>, %219, %cst_77 [1] : vector<8x128xf32> to vector<8xf32>
    %221 = vector.shape_cast %220 : vector<8xf32> to vector<8x1xf32>
    %222 = arith.mulf %62, %218 : vector<8x128xf32>
    %cst_78 = arith.constant dense<0.000000e+00> : vector<8xf32>
    %223 = vector.multi_reduction <add>, %222, %cst_78 [1] : vector<8x128xf32> to vector<8xf32>
    %224 = vector.shape_cast %223 : vector<8xf32> to vector<8x1xf32>
    %225 = arith.mulf %88, %218 : vector<8x128xf32>
    %cst_79 = arith.constant dense<0.000000e+00> : vector<8xf32>
    %226 = vector.multi_reduction <add>, %225, %cst_79 [1] : vector<8x128xf32> to vector<8xf32>
    %227 = vector.shape_cast %226 : vector<8xf32> to vector<8x1xf32>
    %228 = arith.mulf %114, %218 : vector<8x128xf32>
    %cst_80 = arith.constant dense<0.000000e+00> : vector<8xf32>
    %229 = vector.multi_reduction <add>, %228, %cst_80 [1] : vector<8x128xf32> to vector<8xf32>
    %230 = vector.shape_cast %229 : vector<8xf32> to vector<8x1xf32>
    %231 = arith.mulf %140, %218 : vector<8x128xf32>
    %cst_81 = arith.constant dense<0.000000e+00> : vector<8xf32>
    %232 = vector.multi_reduction <add>, %231, %cst_81 [1] : vector<8x128xf32> to vector<8xf32>
    %233 = vector.shape_cast %232 : vector<8xf32> to vector<8x1xf32>
    %234 = arith.mulf %166, %218 : vector<8x128xf32>
    %cst_82 = arith.constant dense<0.000000e+00> : vector<8xf32>
    %235 = vector.multi_reduction <add>, %234, %cst_82 [1] : vector<8x128xf32> to vector<8xf32>
    %236 = vector.shape_cast %235 : vector<8xf32> to vector<8x1xf32>
    %237 = arith.mulf %192, %218 : vector<8x128xf32>
    %cst_83 = arith.constant dense<0.000000e+00> : vector<8xf32>
    %238 = vector.multi_reduction <add>, %237, %cst_83 [1] : vector<8x128xf32> to vector<8xf32>
    %239 = vector.shape_cast %238 : vector<8xf32> to vector<8x1xf32>
    %240 = arith.mulf %218, %218 : vector<8x128xf32>
    %cst_84 = arith.constant dense<0.000000e+00> : vector<8xf32>
    %241 = vector.multi_reduction <add>, %240, %cst_84 [1] : vector<8x128xf32> to vector<8xf32>
    %242 = vector.shape_cast %241 : vector<8xf32> to vector<8x1xf32>
    %243 = arith.maximumf %221, %224 : vector<8x1xf32>
    %244 = arith.maximumf %243, %227 : vector<8x1xf32>
    %245 = arith.maximumf %244, %230 : vector<8x1xf32>
    %246 = arith.maximumf %245, %233 : vector<8x1xf32>
    %247 = arith.maximumf %246, %236 : vector<8x1xf32>
    %248 = arith.maximumf %247, %239 : vector<8x1xf32>
    %249 = arith.maximumf %248, %242 : vector<8x1xf32>
    %250 = arith.subf %221, %249 : vector<8x1xf32>
    %251 = math.exp %250 : vector<8x1xf32>
    %252 = arith.subf %224, %249 : vector<8x1xf32>
    %253 = math.exp %252 : vector<8x1xf32>
    %254 = arith.subf %227, %249 : vector<8x1xf32>
    %255 = math.exp %254 : vector<8x1xf32>
    %256 = arith.subf %230, %249 : vector<8x1xf32>
    %257 = math.exp %256 : vector<8x1xf32>
    %258 = arith.subf %233, %249 : vector<8x1xf32>
    %259 = math.exp %258 : vector<8x1xf32>
    %260 = arith.subf %236, %249 : vector<8x1xf32>
    %261 = math.exp %260 : vector<8x1xf32>
    %262 = arith.subf %239, %249 : vector<8x1xf32>
    %263 = math.exp %262 : vector<8x1xf32>
    %264 = arith.subf %242, %249 : vector<8x1xf32>
    %265 = math.exp %264 : vector<8x1xf32>
    %266 = arith.addf %251, %253 : vector<8x1xf32>
    %267 = arith.addf %266, %255 : vector<8x1xf32>
    %268 = arith.addf %267, %257 : vector<8x1xf32>
    %269 = arith.addf %268, %259 : vector<8x1xf32>
    %270 = arith.addf %269, %261 : vector<8x1xf32>
    %271 = arith.addf %270, %263 : vector<8x1xf32>
    %272 = arith.addf %271, %265 : vector<8x1xf32>
    %273 = tpu.reciprocal %272 {approx = true} : vector<8x1xf32> -> vector<8x1xf32>
    %274 = arith.mulf %251, %273 : vector<8x1xf32>
    %275 = vector.broadcast %274 : vector<8x1xf32> to vector<8x128xf32>
    %276 = arith.mulf %36, %275 : vector<8x128xf32>
    %277 = arith.mulf %253, %273 : vector<8x1xf32>
    %278 = vector.broadcast %277 : vector<8x1xf32> to vector<8x128xf32>
    %279 = arith.mulf %62, %278 : vector<8x128xf32>
    %280 = arith.addf %276, %279 : vector<8x128xf32>
    %281 = arith.mulf %255, %273 : vector<8x1xf32>
    %282 = vector.broadcast %281 : vector<8x1xf32> to vector<8x128xf32>
    %283 = arith.mulf %88, %282 : vector<8x128xf32>
    %284 = arith.addf %280, %283 : vector<8x128xf32>
    %285 = arith.mulf %257, %273 : vector<8x1xf32>
    %286 = vector.broadcast %285 : vector<8x1xf32> to vector<8x128xf32>
    %287 = arith.mulf %114, %286 : vector<8x128xf32>
    %288 = arith.addf %284, %287 : vector<8x128xf32>
    %289 = arith.mulf %259, %273 : vector<8x1xf32>
    %290 = vector.broadcast %289 : vector<8x1xf32> to vector<8x128xf32>
    %291 = arith.mulf %140, %290 : vector<8x128xf32>
    %292 = arith.addf %288, %291 : vector<8x128xf32>
    %293 = arith.mulf %261, %273 : vector<8x1xf32>
    %294 = vector.broadcast %293 : vector<8x1xf32> to vector<8x128xf32>
    %295 = arith.mulf %166, %294 : vector<8x128xf32>
    %296 = arith.addf %292, %295 : vector<8x128xf32>
    %297 = arith.mulf %263, %273 : vector<8x1xf32>
    %298 = vector.broadcast %297 : vector<8x1xf32> to vector<8x128xf32>
    %299 = arith.mulf %192, %298 : vector<8x128xf32>
    %300 = arith.addf %296, %299 : vector<8x128xf32>
    %301 = arith.mulf %265, %273 : vector<8x1xf32>
    %302 = vector.broadcast %301 : vector<8x1xf32> to vector<8x128xf32>
    %303 = arith.mulf %218, %302 : vector<8x128xf32>
    %304 = arith.addf %300, %303 : vector<8x128xf32>
    %305 = arith.truncf %304 : vector<8x128xf32> to vector<8x128xbf16>
    %c0_85 = arith.constant 0 : index
    %c0_86 = arith.constant 0 : index
    %306 = vector.load %arg5[%c0_85, %c0_86] : memref<128x128xbf16, #tpu.memory_space<vmem>>, vector<128x128xbf16>
    %cst_87 = arith.constant dense<0.000000e+00> : vector<8x128xf32>
    %307 = tpu.matmul %305, %306, %cst_87 {dimension_numbers = #tpu.dot_dimension_numbers<[1], [0], [0], [1], [0, 0, 1, 1], [], []>} : vector<8x128xbf16>, vector<128x128xbf16>, vector<8x128xf32> -> vector<8x128xf32>
    %c0_88 = arith.constant 0 : index
    %c0_89 = arith.constant 0 : index
    %308 = vector.load %arg6[%c0_88, %c0_89] : memref<1x128xf32, #tpu.memory_space<vmem>>, vector<1x128xf32>
    %309 = vector.broadcast %308 : vector<1x128xf32> to vector<8x128xf32>
    %310 = arith.addf %307, %309 : vector<8x128xf32>
    %c0_90 = arith.constant 0 : index
    %c0_91 = arith.constant 0 : index
    %311 = vector.load %arg7[%c0_90, %c0_91] : memref<8x128xf32, #tpu.memory_space<vmem>>, vector<8x128xf32>
    tpu.vector_store %arg7[%c0_90, %c0_91], %310 {strides = array<i32>} : memref<8x128xf32, #tpu.memory_space<vmem>>, vector<8x128xf32>,
    return
  }
  func.func @transform_0(%arg0: i32) -> (i32, i32, i32) {
    %c0_i32 = arith.constant 0 : i32
    %c0_i32_0 = arith.constant 0 : i32
    %c0_i32_1 = arith.constant 0 : i32
    return %arg0, %c0_i32, %c0_i32_0 : i32, i32, i32
  }
  func.func @transform_1(%arg0: i32) -> (i32, i32) {
    %c0_i32 = arith.constant 0 : i32
    %c0_i32_0 = arith.constant 0 : i32
    %c0_i32_1 = arith.constant 0 : i32
    return %c0_i32, %c0_i32_0 : i32, i32
  }
  func.func @transform_2(%arg0: i32) -> (i32, i32) {
    %c0_i32 = arith.constant 0 : i32
    %c0_i32_0 = arith.constant 0 : i32
    %c0_i32_1 = arith.constant 0 : i32
    return %c0_i32, %c0_i32_0 : i32, i32
  }
  func.func @transform_3(%arg0: i32) -> (i32, i32) {
    %c0_i32 = arith.constant 0 : i32
    %c0_i32_0 = arith.constant 0 : i32
    %c0_i32_1 = arith.constant 0 : i32
    return %c0_i32, %c0_i32_0 : i32, i32
  }
  func.func @transform_4(%arg0: i32) -> (i32, i32) {
    %c0_i32 = arith.constant 0 : i32
    %c0_i32_0 = arith.constant 0 : i32
    %c0_i32_1 = arith.constant 0 : i32
    return %c0_i32, %c0_i32_0 : i32, i32
  }
  func.func @transform_5(%arg0: i32) -> (i32, i32) {
    %c0_i32 = arith.constant 0 : i32
    %c0_i32_0 = arith.constant 0 : i32
    %c0_i32_1 = arith.constant 0 : i32
    return %c0_i32, %c0_i32_0 : i32, i32
  }
  func.func @transform_6(%arg0: i32) -> (i32, i32) {
    %c0_i32 = arith.constant 0 : i32
    %c0_i32_0 = arith.constant 0 : i32
    return %arg0, %c0_i32 : i32, i32
  }
}

</mosaic_0001>

<bundles_post_ra>
// kernel: tpu_custom_call.1
= control target key start
LH: loop header
LB: loop body
LE: loop exit
PB: predicated region body
PF: predicated region fallthrough
CT: control target
= control target key end

     0   :  { %11 = vsyncpa [#allocation4], 0  ;;  %s2689_s0 = inlined_call_operand.vmem [shape: bf16[1,64,32], index: 0, kind: input, shape index: {}]   ;;  %s2690_s1 = inlined_call_operand.hbm [shape: bf16[32,512], index: 1, kind: input, shape index: {}]   ;;  %s2691_s2 = inlined_call_operand.hbm [shape: bf16[128,512], index: 2, kind: input, shape index: {}]   ;;  %s2692_s3 = inlined_call_operand.vmem [shape: f32[1,512], index: 3, kind: input, shape index: {}]   ;;  %s2693_s4 = inlined_call_operand.hbm [shape: bf16[128,128], index: 4, kind: input, shape index: {}]   ;;  %s2694_s5 = inlined_call_operand.vmem [shape: f32[1,128], index: 5, kind: input, shape index: {}]   ;;  %s2695_s6 = inlined_call_operand.hbm [shape: f32[8,128], index: 6, kind: output, shape index: {}]  }
   0x1   :  { %12 = vsyncpa [#allocation7], 0 }
   0x2   :  { %13 = vsyncpa [#allocation5], 0  ;;  %s2006_s21 = smov [#allocation6]   ;;  %s2007_s23 = smov [#allocation3]  }
   0x3   :  { %s33_s22 = sshll.u32 %s2006_s21, 4  ;;  %s21_s24 = sshll.u32 %s2007_s23, 4  ;;  %s34_s22 = int_to_ptr.vmem [resolvable:$true] %s33_s22  ;;  %s2052_s24 = int_to_ptr.vmem [resolvable:$true] %s21_s24 }
   0x4   :  { %s1912_s27 = scalar_lea.hbm %s2691_s2, 4096 }
   0x5   :  { %p1913_p0 = scmp.ne.s32.totalorder %s2691_s2, %s1912_s27  ;;  %p1916_p1 = scmp.lt.u32.totalorder %s1912_s27, %s2691_s2 }
   0x7   :  { %p1918_p2 = pnand %p1916_p1, %p1913_p0 }
   0x9   :  { %1921 = shalt.err (!%p1918_p2)
}
   0xa   :  { %s1922_s8 = scalar_lea.vmem %s34_s22, 4096  ;;  %p1927_p4 = scmp.lt.s32.totalorder %s34_s22, %s34_s22 }
   0xb   :  { %p1923_p3 = scmp.ne.s32.totalorder %s34_s22, %s1922_s8  ;;  %p1928_p5 = scmp.lt.s32.totalorder %s1922_s8, %s1922_s8 }
   0xd   :  { %p1929_p6 = por %p1928_p5, %p1927_p4 }
   0xf   :  { %p1930_p7 = pnand %p1929_p6, %p1923_p3 }
  0x11   :  { %1933 = shalt.err (!%p1930_p7)
}
  0x12   :  { %s2008_s9 = smov 256   ;;  %s2009_s10 = smov 16  }
  0x13   :  { %39 = dma.hbm_to_vmem [thread:$0]  %s2691_s2, 4096, %s34_s22, [#allocation7], %s2008_s9, %s2008_s9, %s2009_s10  }
  0x14   :  { %s1934_s15 = scalar_lea.hbm %s2690_s1, 1024 }
  0x15   :  { %p1935_p8 = scmp.ne.s32.totalorder %s2690_s1, %s1934_s15  ;;  %p1938_p9 = scmp.lt.u32.totalorder %s1934_s15, %s2690_s1 }
  0x17   :  { %p1940_p10 = pnand %p1938_p9, %p1935_p8 }
  0x19   :  { %1943 = shalt.err (!%p1940_p10)
}
  0x1a   :  { %s1944_s20 = scalar_lea.vmem %s2052_s24, 1024  ;;  %p1949_p12 = scmp.lt.s32.totalorder %s2052_s24, %s2052_s24 }
  0x1b   :  { %p1945_p11 = scmp.ne.s32.totalorder %s2052_s24, %s1944_s20  ;;  %p1950_p13 = scmp.lt.s32.totalorder %s1944_s20, %s1944_s20 }
  0x1d   :  { %p1951_p0 = por %p1950_p13, %p1949_p12 }
  0x1f   :  { %p1952_p1 = pnand %p1951_p0, %p1945_p11 }
  0x21   :  { %1955 = shalt.err (!%p1952_p1)
}
  0x22   :  { %27 = dma.hbm_to_vmem [thread:$0]  %s2690_s1, 1024, %s2052_s24, [#allocation4], %s2008_s9, %s2008_s9, %s2009_s10  }
  0x23   :  { %s2010_s22 = smov [#allocation8]   ;;  %s1956_s27 = scalar_lea.hbm %s2693_s4, 1024 }
  0x24   :  { %s47_s23 = sshll.u32 %s2010_s22, 4  ;;  %p1957_p2 = scmp.ne.s32.totalorder %s2693_s4, %s1956_s27  ;;  %s48_s23 = int_to_ptr.vmem [resolvable:$true] %s47_s23 }
  0x25   :  { %p1960_p3 = scmp.lt.u32.totalorder %s1956_s27, %s2693_s4 }
  0x27   :  { %p1962_p4 = pnand %p1960_p3, %p1957_p2 }
  0x29   :  { %1965 = shalt.err (!%p1962_p4)
}
  0x2a   :  { %s1966_s8 = scalar_lea.vmem %s48_s23, 1024  ;;  %p1971_p6 = scmp.lt.s32.totalorder %s48_s23, %s48_s23 }
  0x2b   :  { %p1967_p5 = scmp.ne.s32.totalorder %s48_s23, %s1966_s8  ;;  %p1972_p7 = scmp.lt.s32.totalorder %s1966_s8, %s1966_s8 }
  0x2d   :  { %p1973_p8 = por %p1972_p7, %p1971_p6 }
  0x2f   :  { %p1974_p9 = pnand %p1973_p8, %p1967_p5 }
  0x31   :  { %1977 = shalt.err (!%p1974_p9)
}
  0x32   :  { %s2011_s1 = smov 64   ;;  %s2012_s24 = smov 4  }
  0x33   :  { %53 = dma.hbm_to_vmem [thread:$0]  %s2693_s4, 1024, %s48_s23, [#allocation7], %s2011_s1, %s2011_s1, %s2012_s24  }
  0x34   :  { %2000 = dma.done.wait [#allocation4], 1024  }
  0x35   :  { %2001 = vsyncadd [#allocation4], 4294966272 }
  0x36   :  { %2002 = dma.done.wait [#allocation7], 5120  }
  0x37   :  { %2003 = vsyncadd [#allocation7], 4294962176  ;;  %v2696_v0 = vmov 0   ;;  %v1710_v1 = vld [vmem:[#allocation3 + $0x4] ss:$16 sps:$4 sm:$0xff]   ;;  %vm164_vm0 = vcmask 261120   ;;  %v84_v45 = vlaneseq }
  0x38   :  { %209 = vmatprep.mubr.bf16.mxu0 %v2696_v0  ;;  %282 = vmatprep.mubr.bf16.mxu1 %v2696_v0  ;;  %v1712_v2 = vld [vmem:[#allocation3 + $0xc] ss:$16 sps:$4 sm:$0xff]   ;;  %v1714_v3 = vld [vmem:[#allocation3] ss:$16 sps:$4 sm:$0xff]   ;;  %v1715_v4 = vld [vmem:[#allocation3 + $0x8] ss:$16 sps:$4 sm:$0xff]  }
  0x39   :  { %177 = vmatprep.subr.bf16.mxu0 %v1710_v1  ;;  %250 = vmatprep.subr.bf16.mxu1 %v1712_v2  ;;  %v1716_v5 = vld [vmem:[#allocation3 + $0x24] ss:$16 sps:$4 sm:$0xff]   ;;  %v1718_v6 = vld [vmem:[#allocation3 + $0x2c] ss:$16 sps:$4 sm:$0xff]   ;;  %v1720_v7 = vld [vmem:[#allocation3 + $0x20] ss:$16 sps:$4 sm:$0xff]  }
  0x3a   :  { %178 = vmatpush1.bf16.msra.mxu0 %v1714_v3  ;;  %251 = vmatpush1.bf16.msra.mxu1 %v1715_v4  ;;  %v1721_v8 = vld [vmem:[#allocation3 + $0x28] ss:$16 sps:$4 sm:$0xff]   ;;  %v1722_v9 = vld [vmem:[%s2689_s0] sm:$0xff]   ;;  %v2102_v11 = vld [vmem:[#allocation6 + $0xc] ss:$16 sps:$4 sm:$0xff]   ;;  %v85_v46 = vshrl.u32 %v84_v45, 7 }
  0x3b   :  { %179 = vmatprep.subr.bf16.mxu0 %v1716_v5  ;;  %252 = vmatprep.subr.bf16.mxu1 %v1718_v6  ;;  %v2100_v10 = vld [vmem:[#allocation6 + $0x4] ss:$16 sps:$4 sm:$0xff]   ;;  %v2104_v12 = vld [vmem:[#allocation6] ss:$16 sps:$4 sm:$0xff]   ;;  %v2106_v13 = vld [vmem:[#allocation6 + $0x8] ss:$16 sps:$4 sm:$0xff]  }
  0x3c   :  { %v2109_v14 = vld [vmem:[#allocation6 + $0x24] ss:$16 sps:$4 sm:$0xff]   ;;  %v2112_v15 = vld [vmem:[#allocation6 + $0x2c] ss:$16 sps:$4 sm:$0xff]   ;;  %v2116_v16 = vld [vmem:[#allocation6 + $0x20] ss:$16 sps:$4 sm:$0xff]  }
  0x3d   :  { %v2120_v17 = vld [vmem:[#allocation6 + $0x28] ss:$16 sps:$4 sm:$0xff]   ;;  %v2124_v18 = vld [vmem:[#allocation6 + $0x44] ss:$16 sps:$4 sm:$0xff]   ;;  %v2131_v20 = vld [vmem:[#allocation6 + $0x4c] ss:$16 sps:$4 sm:$0xff]  }
  0x3e   :  { %180 = vmatpush1.bf16.msra.mxu0 %v1720_v7  ;;  %253 = vmatpush1.bf16.msra.mxu1 %v1721_v8  ;;  %v1735_v19 = vld [vmem:[%s2689_s0 + $0x8] sm:$0xff]   ;;  %v2133_v21 = vld [vmem:[#allocation6 + $0x40] ss:$16 sps:$4 sm:$0xff]   ;;  %v2141_v23 = vld [vmem:[#allocation6 + $0x64] ss:$16 sps:$4 sm:$0xff]   ;;  %v94_v47 = vsub.s32 2, %v85_v46 }
  0x3f   :  { %551 = vmatprep.subr.bf16.mxu0 %v2100_v10  ;;  %592 = vmatprep.subr.bf16.mxu1 %v2102_v11  ;;  %v2137_v22 = vld [vmem:[#allocation6 + $0x48] ss:$16 sps:$4 sm:$0xff]   ;;  %v2143_v24 = vld [vmem:[#allocation6 + $0x6c] ss:$16 sps:$4 sm:$0xff]   ;;  %v2147_v25 = vld [vmem:[#allocation6 + $0x60] ss:$16 sps:$4 sm:$0xff]  }
  0x40   :  { %v2151_v26 = vld [vmem:[#allocation6 + $0x68] ss:$16 sps:$4 sm:$0xff]   ;;  %v2155_v27 = vld [vmem:[#allocation6 + $0x84] ss:$16 sps:$4 sm:$0xff]   ;;  %v2157_v28 = vld [vmem:[#allocation6 + $0x8c] ss:$16 sps:$4 sm:$0xff]  }
  0x41   :  { %1621 = vmatmul.mubr.msk.bf16.vlgmr.msra.gmra.mrb[0].mxu0 %vm164_vm0, %v1722_v9  ;;  %1625 = vmatmul.mubr.msk.bf16.vlgmr.msra.gmra.mrb[0].mxu1 %vm164_vm0, %v1722_v9  ;;  %v1748_v29 = vld [vmem:[%s2689_s0 + $0x10] sm:$0xff]   ;;  %v2166_v31 = vld [vmem:[#allocation6 + $0x88] ss:$16 sps:$4 sm:$0xff]   ;;  %v2174_v33 = vld [vmem:[#allocation6 + $0xac] ss:$16 sps:$4 sm:$0xff]   ;;  %v98_v48 = vsub.s32 3, %v85_v46 }
  0x42   :  { %552 = vmatpush1.bf16.msra.mxu0 %v2104_v12  ;;  %593 = vmatpush1.bf16.msra.mxu1 %v2106_v13  ;;  %v2164_v30 = vld [vmem:[#allocation6 + $0x80] ss:$16 sps:$4 sm:$0xff]   ;;  %v2170_v32 = vld [vmem:[#allocation6 + $0xa4] ss:$16 sps:$4 sm:$0xff]   ;;  %v2180_v35 = vld [vmem:[#allocation6 + $0xa8] ss:$16 sps:$4 sm:$0xff]  }
  0x43   :  { %553 = vmatprep.subr.bf16.mxu0 %v2109_v14  ;;  %594 = vmatprep.subr.bf16.mxu1 %v2112_v15  ;;  %v2178_v34 = vld [vmem:[#allocation6 + $0xa0] ss:$16 sps:$4 sm:$0xff]   ;;  %v2184_v36 = vld [vmem:[#allocation6 + $0xc4] ss:$16 sps:$4 sm:$0xff]   ;;  %v2188_v37 = vld [vmem:[#allocation6 + $0xcc] ss:$16 sps:$4 sm:$0xff]  }
  0x44   :  { %219 = vmatprep.mubr.bf16.mxu0 %v2696_v0  ;;  %292 = vmatprep.mubr.bf16.mxu1 %v2696_v0  ;;  %v1761_v38 = vld [vmem:[%s2689_s0 + $0x18] sm:$0xff]   ;;  %v2195_v39 = vld [vmem:[#allocation6 + $0xc0] ss:$16 sps:$4 sm:$0xff]   ;;  %v2199_v41 = vld [vmem:[#allocation6 + $0xe4] ss:$16 sps:$4 sm:$0xff]   ;;  %v86_v49 = vsub.s32 0, %v85_v46 }
  0x45   :  { %v2197_v40 = vld [vmem:[#allocation6 + $0xc8] ss:$16 sps:$4 sm:$0xff]   ;;  %v2201_v42 = vld [vmem:[#allocation6 + $0xec] ss:$16 sps:$4 sm:$0xff]   ;;  %v2211_v43 = vld [vmem:[#allocation6 + $0xe0] ss:$16 sps:$4 sm:$0xff]  }
  0x46   :  { %554 = vmatpush1.bf16.msra.mxu0 %v2116_v16  ;;  %595 = vmatpush1.bf16.msra.mxu1 %v2120_v17  ;;  %v2213_v44 = vld [vmem:[#allocation6 + $0xe8] ss:$16 sps:$4 sm:$0xff]   ;;  %v82_v50 = vld [vmem:[%s2692_s3] sm:$0xf]  ;;  %v90_v51 = vsub.s32 1, %v85_v46  ;;  %vm2015_vm1 = vmmov 0  }
  0x47   :  { %555 = vmatprep.subr.bf16.mxu0 %v2124_v18  ;;  %596 = vmatprep.subr.bf16.mxu1 %v2131_v20  ;;  %v2262_v52 = vrot.slane %v82_v50, %v94_v47  ;;  %v2268_v55 = vrot.slane %v82_v50, %v98_v48  ;;  %v87_v56 = vrot.slane %v82_v50, %v86_v49  ;;  %s2016_s20 = smov [#allocation9]  }
  0x48   :  { %v91_v59 = vrot.slane %v82_v50, %v90_v51  ;;  %s1599_s2 = sshll.u32 %s2016_s20, 4  ;;  %s1600_s2 = int_to_ptr.vmem [resolvable:$true] %s1599_s2 }
  0x49   :  { %1622 = vmatmul.mubr.msk.bf16.gmra.mrb[4].mxu0 %vm164_vm0, %v1735_v19  ;;  %1626 = vmatmul.mubr.msk.bf16.gmra.mrb[4].mxu1 %vm164_vm0, %v1735_v19  ;;  %s1978_s21 = scalar_lea.vmem %s1600_s2, 128  ;;  %p1983_p11 = scmp.lt.s32.totalorder %s1600_s2, %s1600_s2 }
  0x4a   :  { %556 = vmatpush1.bf16.msra.mxu0 %v2133_v21  ;;  %597 = vmatpush1.bf16.msra.mxu1 %v2137_v22  ;;  %p1979_p10 = scmp.ne.s32.totalorder %s1600_s2, %s1978_s21  ;;  %p1984_p12 = scmp.lt.s32.totalorder %s1978_s21, %s1978_s21 }
  0x4b   :  { %557 = vmatprep.subr.bf16.mxu0 %v2141_v23  ;;  %598 = vmatprep.subr.bf16.mxu1 %v2143_v24 }
  0x4c   :  { %229 = vmatprep.mubr.bf16.mxu0 %v2696_v0  ;;  %302 = vmatprep.mubr.bf16.mxu1 %v2696_v0  ;;  %p1985_p13 = por %p1984_p12, %p1983_p11 }
  0x4e   :  { %558 = vmatpush1.bf16.msra.mxu0 %v2147_v25  ;;  %599 = vmatpush1.bf16.msra.mxu1 %v2151_v26  ;;  %p1986_p0 = pnand %p1985_p13, %p1979_p10 }
  0x4f   :  { %559 = vmatprep.subr.bf16.mxu0 %v2155_v27  ;;  %600 = vmatprep.subr.bf16.mxu1 %v2157_v28 }
  0x51   :  { %1623 = vmatmul.mubr.msk.bf16.gmra.mrb[8].mxu0 %vm164_vm0, %v1748_v29  ;;  %1627 = vmatmul.mubr.msk.bf16.gmra.mrb[8].mxu1 %vm164_vm0, %v1748_v29 }
  0x52   :  { %560 = vmatpush1.bf16.msra.mxu0 %v2164_v30  ;;  %601 = vmatpush1.bf16.msra.mxu1 %v2166_v31 }
  0x53   :  { %561 = vmatprep.subr.bf16.mxu0 %v2170_v32  ;;  %602 = vmatprep.subr.bf16.mxu1 %v2174_v33 }
  0x54   :  { %239 = vmatprep.mubr.bf16.mxu0 %v2696_v0  ;;  %312 = vmatprep.mubr.bf16.mxu1 %v2696_v0 }
  0x56   :  { %562 = vmatpush1.bf16.msra.mxu0 %v2178_v34  ;;  %603 = vmatpush1.bf16.msra.mxu1 %v2180_v35 }
  0x57   :  { %563 = vmatprep.subr.bf16.mxu0 %v2184_v36  ;;  %604 = vmatprep.subr.bf16.mxu1 %v2188_v37 }
  0x59   :  { %1624 = vmatmul.mubr.msk.bf16.gmra.mrb[12].mxu0 %vm164_vm0, %v1761_v38  ;;  %1628 = vmatmul.mubr.msk.bf16.gmra.mrb[12].mxu1 %vm164_vm0, %v1761_v38 }
  0x5a   :  { %564 = vmatpush1.bf16.msra.mxu0 %v2195_v39  ;;  %605 = vmatpush1.bf16.msra.mxu1 %v2197_v40 }
  0x5b   :  { %565 = vmatprep.subr.bf16.mxu0 %v2199_v41  ;;  %606 = vmatprep.subr.bf16.mxu1 %v2201_v42 }
  0x5c   :  { %583 = vmatprep.mubr.bf16.mxu0 %v2696_v0  ;;  %624 = vmatprep.mubr.bf16.mxu1 %v2696_v0 }
  0x5e   :  { %566 = vmatpush1.bf16.msra.mxu0 %v2211_v43  ;;  %607 = vmatpush1.bf16.msra.mxu1 %v2213_v44 }
  0x5f   :  { %657 = vmatprep.subr.bf16.mxu0 %v2100_v10  ;;  %698 = vmatprep.subr.bf16.mxu1 %v2102_v11 }
  0x61   :  { %584 = vmatmul.mubr.bf16.vlgmr.msra.gmra.mrb[16].mxu0 %v2696_v0  ;;  %625 = vmatmul.mubr.bf16.vlgmr.msra.gmra.mrb[16].mxu1 %v2696_v0 }
  0x62   :  { %658 = vmatpush1.bf16.msra.mxu0 %v2104_v12  ;;  %699 = vmatpush1.bf16.msra.mxu1 %v2106_v13 }
  0x63   :  { %659 = vmatprep.subr.bf16.mxu0 %v2109_v14  ;;  %700 = vmatprep.subr.bf16.mxu1 %v2112_v15 }
  0x64   :  { %689 = vmatprep.mubr.bf16.mxu0 %v2696_v0  ;;  %730 = vmatprep.mubr.bf16.mxu1 %v2696_v0 }
  0x66   :  { %660 = vmatpush1.bf16.msra.mxu0 %v2116_v16  ;;  %701 = vmatpush1.bf16.msra.mxu1 %v2120_v17 }
  0x67   :  { %661 = vmatprep.subr.bf16.mxu0 %v2124_v18  ;;  %702 = vmatprep.subr.bf16.mxu1 %v2131_v20 }
  0x6a   :  { %662 = vmatpush1.bf16.msra.mxu0 %v2133_v21  ;;  %703 = vmatpush1.bf16.msra.mxu1 %v2137_v22 }
  0x6b   :  { %663 = vmatprep.subr.bf16.mxu0 %v2141_v23  ;;  %704 = vmatprep.subr.bf16.mxu1 %v2143_v24 }
  0x6e   :  { %664 = vmatpush1.bf16.msra.mxu0 %v2147_v25  ;;  %705 = vmatpush1.bf16.msra.mxu1 %v2151_v26 }
  0x6f   :  { %665 = vmatprep.subr.bf16.mxu0 %v2155_v27  ;;  %706 = vmatprep.subr.bf16.mxu1 %v2157_v28 }
  0x72   :  { %666 = vmatpush1.bf16.msra.mxu0 %v2164_v30  ;;  %707 = vmatpush1.bf16.msra.mxu1 %v2166_v31 }
  0x73   :  { %667 = vmatprep.subr.bf16.mxu0 %v2170_v32  ;;  %708 = vmatprep.subr.bf16.mxu1 %v2174_v33 }
  0x76   :  { %668 = vmatpush1.bf16.msra.mxu0 %v2178_v34  ;;  %709 = vmatpush1.bf16.msra.mxu1 %v2180_v35 }
  0x77   :  { %669 = vmatprep.subr.bf16.mxu0 %v2184_v36  ;;  %710 = vmatprep.subr.bf16.mxu1 %v2188_v37 }
  0x7a   :  { %670 = vmatpush1.bf16.msra.mxu0 %v2195_v39  ;;  %711 = vmatpush1.bf16.msra.mxu1 %v2197_v40 }
  0x7b   :  { %671 = vmatprep.subr.bf16.mxu0 %v2199_v41  ;;  %712 = vmatprep.subr.bf16.mxu1 %v2201_v42 }
  0x7e   :  { %672 = vmatpush1.bf16.msra.mxu0 %v2211_v43  ;;  %713 = vmatpush1.bf16.msra.mxu1 %v2213_v44 }
  0x7f   :  { %763 = vmatprep.subr.bf16.mxu0 %v2100_v10  ;;  %804 = vmatprep.subr.bf16.mxu1 %v2102_v11 }
 0x114   :  { %v2264_v53 = vpop.f32.mrb[0].mxu0  ;;  %v2266_v54 = vpop.f32.mrb[0].mxu1 }
 0x115   :  { %v213_v57 = vpop.f32.mrb[1].mxu0  ;;  %v286_v58 = vpop.f32.mrb[1].mxu1 }
 0x116   :  { %v215_v60 = vpop.f32.mrb[2].mxu0  ;;  %v288_v61 = vpop.f32.mrb[2].mxu1 }
 0x117   :  { %v2270_v62 = vadd.f32 %v215_v60, %v87_v56  ;;  %v217_v63 = vpop.f32.mrb[3].mxu0  ;;  %v2273_v1 = vadd.f32 %v288_v61, %v2262_v52  ;;  %v290_v2 = vpop.f32.mrb[3].mxu1 }
 0x118   :  { %v2275_v3 = vadd.f32 %v217_v63, %v91_v59  ;;  %v2278_v4 = vadd.f32 %v290_v2, %v2268_v55 }
 0x11c   :  { %v221_v5 = vpop.f32.mrb[4].mxu0  ;;  %v294_v6 = vpop.f32.mrb[4].mxu1 }
 0x11d   :  { %v2280_v7 = vadd.f32 %v221_v5, %v87_v56  ;;  %v223_v8 = vpop.f32.mrb[5].mxu0  ;;  %v2283_v9 = vadd.f32 %v294_v6, %v2262_v52  ;;  %v296_v19 = vpop.f32.mrb[5].mxu1 }
 0x11e   :  { %v2285_v29 = vadd.f32 %v223_v8, %v91_v59  ;;  %v225_v38 = vpop.f32.mrb[6].mxu0  ;;  %v2288_v45 = vadd.f32 %v296_v19, %v2268_v55  ;;  %v298_v46 = vpop.f32.mrb[6].mxu1 }
 0x11f   :  { %v2290_v47 = vadd.f32 %v225_v38, %v87_v56  ;;  %v227_v48 = vpop.f32.mrb[7].mxu0  ;;  %v2293_v49 = vadd.f32 %v298_v46, %v2262_v52  ;;  %v300_v50 = vpop.f32.mrb[7].mxu1 }
 0x120   :  { %v2295_v51 = vadd.f32 %v227_v48, %v91_v59  ;;  %v2298_v60 = vadd.f32 %v300_v50, %v2268_v55 }
 0x121   :  { %2698 = vst [vmem:[#allocation13_spill] sm:$0xff] %v2290_v47  ;;  %2699 = vst [vmem:[#allocation14_spill] sm:$0xff] %v2293_v49 }
 0x122   :  { %2700 = vst [vmem:[#allocation15_spill] sm:$0xff] %v2295_v51  ;;  %2701 = vst [vmem:[#allocation16_spill] sm:$0xff] %v2298_v60 }
 0x124   :  { %v231_v61 = vpop.f32.mrb[8].mxu0  ;;  %v304_v63 = vpop.f32.mrb[8].mxu1 }
 0x125   :  { %v2300_v2 = vadd.f32 %v231_v61, %v87_v56  ;;  %v233_v5 = vpop.f32.mrb[9].mxu0  ;;  %v2303_v6 = vadd.f32 %v304_v63, %v2262_v52  ;;  %v306_v8 = vpop.f32.mrb[9].mxu1 }
 0x126   :  { %v2305_v19 = vadd.f32 %v233_v5, %v91_v59  ;;  %v235_v38 = vpop.f32.mrb[10].mxu0  ;;  %v2308_v46 = vadd.f32 %v306_v8, %v2268_v55  ;;  %v308_v48 = vpop.f32.mrb[10].mxu1 }
 0x127   :  { %2702 = vst [vmem:[#allocation17_spill] sm:$0xff] %v2300_v2  ;;  %2703 = vst [vmem:[#allocation18_spill] sm:$0xff] %v2303_v6  ;;  %v2310_v0 = vadd.f32 %v235_v38, %v87_v56  ;;  %v237_v50 = vpop.f32.mrb[11].mxu0  ;;  %v2313_v60 = vadd.f32 %v308_v48, %v2262_v52  ;;  %v310_v61 = vpop.f32.mrb[11].mxu1 }
 0x128   :  { %2704 = vst [vmem:[#allocation19_spill] sm:$0xff] %v2305_v19  ;;  %2705 = vst [vmem:[#allocation20_spill] sm:$0xff] %v2308_v46  ;;  %v2315_v2 = vadd.f32 %v237_v50, %v91_v59  ;;  %v2318_v63 = vadd.f32 %v310_v61, %v2268_v55 }
 0x129   :  { %2706 = vst [vmem:[#allocation21_spill] sm:$0xff] %v2310_v0  ;;  %2707 = vst [vmem:[#allocation22_spill] sm:$0xff] %v2313_v60 }
 0x12a   :  { %2708 = vst [vmem:[#allocation23_spill] sm:$0xff] %v2315_v2  ;;  %2709 = vst [vmem:[#allocation24_spill] sm:$0xff] %v2318_v63 }
 0x12c   :  { %v241_v6 = vpop.f32.mrb[12].mxu0  ;;  %v314_v5 = vpop.f32.mrb[12].mxu1 }
 0x12d   :  { %v2320_v19 = vadd.f32 %v241_v6, %v87_v56  ;;  %v243_v51 = vpop.f32.mrb[13].mxu0  ;;  %v2323_v8 = vadd.f32 %v314_v5, %v2262_v52  ;;  %v316_v38 = vpop.f32.mrb[13].mxu1 }
 0x12e   :  { %v2325_v0 = vadd.f32 %v243_v51, %v91_v59  ;;  %v245_v46 = vpop.f32.mrb[14].mxu0  ;;  %v2328_v48 = vadd.f32 %v316_v38, %v2268_v55  ;;  %v318_v50 = vpop.f32.mrb[14].mxu1  ;;  %v212_v51 = vadd.f32 %v2264_v53, %v87_v56  ;;  %v214_v38 = vadd.f32 %v213_v57, %v91_v59 }
 0x12f   :  { %2710 = vst [vmem:[#allocation25_spill] sm:$0xff] %v2320_v19  ;;  %2711 = vst [vmem:[#allocation26_spill] sm:$0xff] %v2323_v8  ;;  %v2330_v2 = vadd.f32 %v245_v46, %v87_v56  ;;  %v247_v61 = vpop.f32.mrb[15].mxu0  ;;  %v2333_v63 = vadd.f32 %v318_v50, %v2262_v52  ;;  %v320_v6 = vpop.f32.mrb[15].mxu1 }
 0x130   :  { %2712 = vst [vmem:[#allocation27_spill] sm:$0xff] %v2325_v0  ;;  %2713 = vst [vmem:[#allocation28_spill] sm:$0xff] %v2328_v48  ;;  %v2335_v19 = vadd.f32 %v247_v61, %v91_v59  ;;  %v2338_v5 = vadd.f32 %v320_v6, %v2268_v55  ;;  %v285_v0 = vadd.f32 %v2266_v54, %v2262_v52 }
 0x131   :  { %2714 = vst [vmem:[#allocation29_spill] sm:$0xff] %v2330_v2  ;;  %2715 = vst [vmem:[#allocation30_spill] sm:$0xff] %v2333_v63  ;;  %v287_v48 = vadd.f32 %v286_v58, %v2268_v55 }
 0x132   :  { %2716 = vst [vmem:[#allocation31_spill] sm:$0xff] %v2335_v19  ;;  %2717 = vst [vmem:[#allocation32_spill] sm:$0xff] %v2338_v5 }
 0x134   :  { %v585_v46 = vpop.f32.mrb[16].mxu0  ;;  %v626_v2 = vpop.f32.mrb[16].mxu1 }
 0x135   :  { %v633_v8 = vadd.f32 %v585_v46, %v212_v51  ;;  %v635_v60 = vadd.f32 %v626_v2, %v285_v0  ;;  %v587_v50 = vpop.f32.mrb[17].mxu0  ;;  %v628_v63 = vpop.f32.mrb[17].mxu1 }
 0x136   :  { %v634_v49 = vadd.f32 %v587_v50, %v214_v38  ;;  %v636_v61 = vadd.f32 %v628_v63, %v287_v48  ;;  %v589_v19 = vpop.f32.mrb[18].mxu0  ;;  %v630_v47 = vpop.f32.mrb[18].mxu1  ;;  %v2718_v48 = vmov 0  }
 0x137   :  { %1782 = vtanh.f32 %v633_v8  ;;  %v590_v6 = vpop.f32.mrb[19].mxu0  ;;  %v631_v5 = vpop.f32.mrb[19].mxu1 }
 0x138   :  { %1784 = vtanh.f32 %v634_v49 }
 0x139   :  { %1786 = vtanh.f32 %v635_v60 }
 0x13a   :  { %1788 = vtanh.f32 %v636_v61 }
 0x141   :  { %v1783_v53 = vpop.eup %1782 }
 0x142   :  { %v641_v52 = vadd.f32 1.0, %v1783_v53  ;;  %v1785_v54 = vpop.eup %1784 }
 0x143   :  { %v643_v55 = vadd.f32 1.0, %v1785_v54  ;;  %v1787_v57 = vpop.eup %1786 }
 0x144   :  { %v642_v56 = vmul.f32 0.5, %v641_v52  ;;  %v1789_v47 = vpop.eup %1788 }
 0x145   :  { %v644_v58 = vmul.f32 0.5, %v643_v55  ;;  %v645_v19 = vadd.f32 1.0, %v1789_v47 }
 0x146   :  { %v648_v0 = vmul.f32 %v1787_v57, %v642_v56 }
 0x147   :  { %v647_v59 = vmul.f32 0.0, %v644_v58  ;;  %v646_v63 = vmul.f32 0.5, %v645_v19 }
 0x149   :  { %v2344_v2 = vadd.f32 %v648_v0, %v647_v59 }
 0x14b   :  { %1790 = vtanh.f32 %v2344_v2 }
 0x155   :  { %v1791_v8 = vpop.eup %1790 }
 0x156   :  { %v2347_v49 = vmul.f32 %v1791_v8, %v646_v63 }
 0x158   :  { %v656_v60 = vpack.c.bf16 %v2347_v49, %v2347_v49 }
 0x15a   :  { %690 = vmatmul.mubr.bf16.vlgmr.msra.gmra.mrb[20].mxu0 %v656_v60  ;;  %731 = vmatmul.mubr.bf16.vlgmr.msra.gmra.mrb[20].mxu1 %v656_v60 }
 0x15b   :  { %764 = vmatpush1.bf16.msra.mxu0 %v2104_v12  ;;  %805 = vmatpush1.bf16.msra.mxu1 %v2106_v13 }
 0x15c   :  { %765 = vmatprep.subr.bf16.mxu0 %v2109_v14  ;;  %806 = vmatprep.subr.bf16.mxu1 %v2112_v15 }
 0x15d   :  { %795 = vmatprep.mubr.bf16.mxu0 %v2718_v48  ;;  %836 = vmatprep.mubr.bf16.mxu1 %v2718_v48 }
 0x15f   :  { %766 = vmatpush1.bf16.msra.mxu0 %v2116_v16  ;;  %807 = vmatpush1.bf16.msra.mxu1 %v2120_v17 }
 0x160   :  { %767 = vmatprep.subr.bf16.mxu0 %v2124_v18  ;;  %808 = vmatprep.subr.bf16.mxu1 %v2131_v20 }
 0x163   :  { %768 = vmatpush1.bf16.msra.mxu0 %v2133_v21  ;;  %809 = vmatpush1.bf16.msra.mxu1 %v2137_v22 }
 0x164   :  { %769 = vmatprep.subr.bf16.mxu0 %v2141_v23  ;;  %810 = vmatprep.subr.bf16.mxu1 %v2143_v24 }
 0x167   :  { %770 = vmatpush1.bf16.msra.mxu0 %v2147_v25  ;;  %811 = vmatpush1.bf16.msra.mxu1 %v2151_v26 }
 0x168   :  { %771 = vmatprep.subr.bf16.mxu0 %v2155_v27  ;;  %812 = vmatprep.subr.bf16.mxu1 %v2157_v28 }
 0x16b   :  { %772 = vmatpush1.bf16.msra.mxu0 %v2164_v30  ;;  %813 = vmatpush1.bf16.msra.mxu1 %v2166_v31 }
 0x16c   :  { %773 = vmatprep.subr.bf16.mxu0 %v2170_v32  ;;  %814 = vmatprep.subr.bf16.mxu1 %v2174_v33 }
 0x16f   :  { %774 = vmatpush1.bf16.msra.mxu0 %v2178_v34  ;;  %815 = vmatpush1.bf16.msra.mxu1 %v2180_v35 }
 0x170   :  { %775 = vmatprep.subr.bf16.mxu0 %v2184_v36  ;;  %816 = vmatprep.subr.bf16.mxu1 %v2188_v37 }
 0x173   :  { %776 = vmatpush1.bf16.msra.mxu0 %v2195_v39  ;;  %817 = vmatpush1.bf16.msra.mxu1 %v2197_v40 }
 0x174   :  { %777 = vmatprep.subr.bf16.mxu0 %v2199_v41  ;;  %818 = vmatprep.subr.bf16.mxu1 %v2201_v42 }
 0x177   :  { %778 = vmatpush1.bf16.msra.mxu0 %v2211_v43  ;;  %819 = vmatpush1.bf16.msra.mxu1 %v2213_v44 }
 0x178   :  { %869 = vmatprep.subr.bf16.mxu0 %v2100_v10  ;;  %910 = vmatprep.subr.bf16.mxu1 %v2102_v11 }
 0x22d   :  { %v691_v5 = vpop.f32.mrb[20].mxu0  ;;  %v732_v51 = vpop.f32.mrb[20].mxu1 }
 0x22e   :  { %v739_v38 = vadd.f32 %v691_v5, %v2270_v62  ;;  %v741_v46 = vadd.f32 %v732_v51, %v2273_v1  ;;  %v693_v50 = vpop.f32.mrb[21].mxu0  ;;  %v734_v61 = vpop.f32.mrb[21].mxu1 }
 0x22f   :  { %v740_v6 = vadd.f32 %v693_v50, %v2275_v3  ;;  %v742_v53 = vadd.f32 %v734_v61, %v2278_v4  ;;  %v695_v52 = vpop.f32.mrb[22].mxu0  ;;  %v736_v54 = vpop.f32.mrb[22].mxu1 }
 0x230   :  { %1792 = vtanh.f32 %v739_v38  ;;  %v696_v56 = vpop.f32.mrb[23].mxu0  ;;  %v737_v55 = vpop.f32.mrb[23].mxu1 }
 0x231   :  { %1794 = vtanh.f32 %v740_v6 }
 0x232   :  { %1796 = vtanh.f32 %v741_v46 }
 0x233   :  { %1798 = vtanh.f32 %v742_v53 }
 0x23a   :  { %v1793_v57 = vpop.eup %1792 }
 0x23b   :  { %v747_v58 = vadd.f32 1.0, %v1793_v57  ;;  %v1795_v0 = vpop.eup %1794 }
 0x23c   :  { %v749_v62 = vadd.f32 1.0, %v1795_v0  ;;  %v1797_v1 = vpop.eup %1796 }
 0x23d   :  { %v748_v59 = vmul.f32 0.5, %v747_v58  ;;  %v1799_v4 = vpop.eup %1798 }
 0x23e   :  { %v750_v47 = vmul.f32 0.5, %v749_v62  ;;  %v751_v8 = vadd.f32 1.0, %v1799_v4 }
 0x23f   :  { %v754_v19 = vmul.f32 %v1797_v1, %v748_v59 }
 0x240   :  { %v753_v3 = vmul.f32 %v750_v47, %v2344_v2  ;;  %v752_v60 = vmul.f32 0.5, %v751_v8 }
 0x242   :  { %v2390_v63 = vadd.f32 %v754_v19, %v753_v3 }
 0x244   :  { %1800 = vtanh.f32 %v2390_v63 }
 0x24e   :  { %v1801_v5 = vpop.eup %1800 }
 0x24f   :  { %v2393_v51 = vmul.f32 %v1801_v5, %v752_v60 }
 0x251   :  { %v762_v38 = vpack.c.bf16 %v2393_v51, %v2393_v51 }
 0x253   :  { %796 = vmatmul.mubr.bf16.vlgmr.msra.gmra.mrb[24].mxu0 %v762_v38  ;;  %837 = vmatmul.mubr.bf16.vlgmr.msra.gmra.mrb[24].mxu1 %v762_v38 }
 0x254   :  { %870 = vmatpush1.bf16.msra.mxu0 %v2104_v12  ;;  %911 = vmatpush1.bf16.msra.mxu1 %v2106_v13 }
 0x255   :  { %871 = vmatprep.subr.bf16.mxu0 %v2109_v14  ;;  %912 = vmatprep.subr.bf16.mxu1 %v2112_v15 }
 0x256   :  { %901 = vmatprep.mubr.bf16.mxu0 %v2718_v48  ;;  %942 = vmatprep.mubr.bf16.mxu1 %v2718_v48 }
 0x258   :  { %872 = vmatpush1.bf16.msra.mxu0 %v2116_v16  ;;  %913 = vmatpush1.bf16.msra.mxu1 %v2120_v17 }
 0x259   :  { %873 = vmatprep.subr.bf16.mxu0 %v2124_v18  ;;  %914 = vmatprep.subr.bf16.mxu1 %v2131_v20 }
 0x25c   :  { %874 = vmatpush1.bf16.msra.mxu0 %v2133_v21  ;;  %915 = vmatpush1.bf16.msra.mxu1 %v2137_v22 }
 0x25d   :  { %875 = vmatprep.subr.bf16.mxu0 %v2141_v23  ;;  %916 = vmatprep.subr.bf16.mxu1 %v2143_v24 }
 0x260   :  { %876 = vmatpush1.bf16.msra.mxu0 %v2147_v25  ;;  %917 = vmatpush1.bf16.msra.mxu1 %v2151_v26 }
 0x261   :  { %877 = vmatprep.subr.bf16.mxu0 %v2155_v27  ;;  %918 = vmatprep.subr.bf16.mxu1 %v2157_v28 }
 0x264   :  { %878 = vmatpush1.bf16.msra.mxu0 %v2164_v30  ;;  %919 = vmatpush1.bf16.msra.mxu1 %v2166_v31 }
 0x265   :  { %879 = vmatprep.subr.bf16.mxu0 %v2170_v32  ;;  %920 = vmatprep.subr.bf16.mxu1 %v2174_v33 }
 0x268   :  { %880 = vmatpush1.bf16.msra.mxu0 %v2178_v34  ;;  %921 = vmatpush1.bf16.msra.mxu1 %v2180_v35 }
 0x269   :  { %881 = vmatprep.subr.bf16.mxu0 %v2184_v36  ;;  %922 = vmatprep.subr.bf16.mxu1 %v2188_v37 }
 0x26c   :  { %882 = vmatpush1.bf16.msra.mxu0 %v2195_v39  ;;  %923 = vmatpush1.bf16.msra.mxu1 %v2197_v40 }
 0x26d   :  { %883 = vmatprep.subr.bf16.mxu0 %v2199_v41  ;;  %924 = vmatprep.subr.bf16.mxu1 %v2201_v42 }
 0x270   :  { %884 = vmatpush1.bf16.msra.mxu0 %v2211_v43  ;;  %925 = vmatpush1.bf16.msra.mxu1 %v2213_v44 }
 0x271   :  { %975 = vmatprep.subr.bf16.mxu0 %v2100_v10  ;;  %1016 = vmatprep.subr.bf16.mxu1 %v2102_v11 }
 0x326   :  { %v797_v2 = vpop.f32.mrb[24].mxu0  ;;  %v838_v46 = vpop.f32.mrb[24].mxu1 }
 0x327   :  { %v845_v50 = vadd.f32 %v797_v2, %v2280_v7  ;;  %v847_v61 = vadd.f32 %v838_v46, %v2283_v9  ;;  %v799_v6 = vpop.f32.mrb[25].mxu0  ;;  %v840_v53 = vpop.f32.mrb[25].mxu1  ;;  %v2719_v46 = vld [vmem:[#allocation13_spill] sm:$0xff] }
 0x328   :  { %v846_v52 = vadd.f32 %v799_v6, %v2285_v29  ;;  %v848_v54 = vadd.f32 %v840_v53, %v2288_v45  ;;  %v801_v56 = vpop.f32.mrb[26].mxu0  ;;  %v842_v55 = vpop.f32.mrb[26].mxu1 }
 0x329   :  { %1802 = vtanh.f32 %v845_v50  ;;  %v802_v57 = vpop.f32.mrb[27].mxu0  ;;  %v843_v58 = vpop.f32.mrb[27].mxu1  ;;  %v2722_v55 = vld [vmem:[#allocation16_spill] sm:$0xff] }
 0x32a   :  { %1804 = vtanh.f32 %v846_v52 }
 0x32b   :  { %1806 = vtanh.f32 %v847_v61  ;;  %v2720_v61 = vld [vmem:[#allocation14_spill] sm:$0xff] }
 0x32c   :  { %1808 = vtanh.f32 %v848_v54  ;;  %v2721_v54 = vld [vmem:[#allocation15_spill] sm:$0xff] }
 0x333   :  { %v1803_v0 = vpop.eup %1802 }
 0x334   :  { %v853_v59 = vadd.f32 1.0, %v1803_v0  ;;  %v1805_v62 = vpop.eup %1804 }
 0x335   :  { %v855_v7 = vadd.f32 1.0, %v1805_v62  ;;  %v1807_v9 = vpop.eup %1806 }
 0x336   :  { %v854_v1 = vmul.f32 0.5, %v853_v59  ;;  %v1809_v45 = vpop.eup %1808 }
 0x337   :  { %v856_v47 = vmul.f32 0.5, %v855_v7  ;;  %v857_v4 = vadd.f32 1.0, %v1809_v45 }
 0x338   :  { %v860_v19 = vmul.f32 %v1807_v9, %v854_v1 }
 0x339   :  { %v859_v29 = vmul.f32 %v856_v47, %v2390_v63  ;;  %v858_v8 = vmul.f32 0.5, %v857_v4 }
 0x33b   :  { %v2436_v3 = vadd.f32 %v860_v19, %v859_v29 }
 0x33d   :  { %1810 = vtanh.f32 %v2436_v3 }
 0x347   :  { %v1811_v60 = vpop.eup %1810 }
 0x348   :  { %v2439_v5 = vmul.f32 %v1811_v60, %v858_v8 }
 0x34a   :  { %v868_v38 = vpack.c.bf16 %v2439_v5, %v2439_v5 }
 0x34c   :  { %902 = vmatmul.mubr.bf16.vlgmr.msra.gmra.mrb[28].mxu0 %v868_v38  ;;  %943 = vmatmul.mubr.bf16.vlgmr.msra.gmra.mrb[28].mxu1 %v868_v38 }
 0x34d   :  { %976 = vmatpush1.bf16.msra.mxu0 %v2104_v12  ;;  %1017 = vmatpush1.bf16.msra.mxu1 %v2106_v13 }
 0x34e   :  { %977 = vmatprep.subr.bf16.mxu0 %v2109_v14  ;;  %1018 = vmatprep.subr.bf16.mxu1 %v2112_v15 }
 0x34f   :  { %1007 = vmatprep.mubr.bf16.mxu0 %v2718_v48  ;;  %1048 = vmatprep.mubr.bf16.mxu1 %v2718_v48 }
 0x351   :  { %978 = vmatpush1.bf16.msra.mxu0 %v2116_v16  ;;  %1019 = vmatpush1.bf16.msra.mxu1 %v2120_v17 }
 0x352   :  { %979 = vmatprep.subr.bf16.mxu0 %v2124_v18  ;;  %1020 = vmatprep.subr.bf16.mxu1 %v2131_v20 }
 0x355   :  { %980 = vmatpush1.bf16.msra.mxu0 %v2133_v21  ;;  %1021 = vmatpush1.bf16.msra.mxu1 %v2137_v22 }
 0x356   :  { %981 = vmatprep.subr.bf16.mxu0 %v2141_v23  ;;  %1022 = vmatprep.subr.bf16.mxu1 %v2143_v24 }
 0x359   :  { %982 = vmatpush1.bf16.msra.mxu0 %v2147_v25  ;;  %1023 = vmatpush1.bf16.msra.mxu1 %v2151_v26 }
 0x35a   :  { %983 = vmatprep.subr.bf16.mxu0 %v2155_v27  ;;  %1024 = vmatprep.subr.bf16.mxu1 %v2157_v28 }
 0x35d   :  { %984 = vmatpush1.bf16.msra.mxu0 %v2164_v30  ;;  %1025 = vmatpush1.bf16.msra.mxu1 %v2166_v31 }
 0x35e   :  { %985 = vmatprep.subr.bf16.mxu0 %v2170_v32  ;;  %1026 = vmatprep.subr.bf16.mxu1 %v2174_v33 }
 0x361   :  { %986 = vmatpush1.bf16.msra.mxu0 %v2178_v34  ;;  %1027 = vmatpush1.bf16.msra.mxu1 %v2180_v35 }
 0x362   :  { %987 = vmatprep.subr.bf16.mxu0 %v2184_v36  ;;  %1028 = vmatprep.subr.bf16.mxu1 %v2188_v37 }
 0x365   :  { %988 = vmatpush1.bf16.msra.mxu0 %v2195_v39  ;;  %1029 = vmatpush1.bf16.msra.mxu1 %v2197_v40 }
 0x366   :  { %989 = vmatprep.subr.bf16.mxu0 %v2199_v41  ;;  %1030 = vmatprep.subr.bf16.mxu1 %v2201_v42 }
 0x369   :  { %990 = vmatpush1.bf16.msra.mxu0 %v2211_v43  ;;  %1031 = vmatpush1.bf16.msra.mxu1 %v2213_v44 }
 0x36a   :  { %1081 = vmatprep.subr.bf16.mxu0 %v2100_v10  ;;  %1122 = vmatprep.subr.bf16.mxu1 %v2102_v11 }
 0x41f   :  { %v903_v63 = vpop.f32.mrb[28].mxu0  ;;  %v944_v2 = vpop.f32.mrb[28].mxu1 }
 0x420   :  { %v951_v50 = vadd.f32 %v903_v63, %v2719_v46  ;;  %v953_v6 = vadd.f32 %v944_v2, %v2720_v61  ;;  %v905_v53 = vpop.f32.mrb[29].mxu0  ;;  %v946_v52 = vpop.f32.mrb[29].mxu1 }
 0x421   :  { %v952_v56 = vadd.f32 %v905_v53, %v2721_v54  ;;  %v954_v57 = vadd.f32 %v946_v52, %v2722_v55  ;;  %v907_v58 = vpop.f32.mrb[30].mxu0  ;;  %v948_v0 = vpop.f32.mrb[30].mxu1 }
 0x422   :  { %1812 = vtanh.f32 %v951_v50  ;;  %v908_v59 = vpop.f32.mrb[31].mxu0  ;;  %v949_v62 = vpop.f32.mrb[31].mxu1 }
 0x423   :  { %1814 = vtanh.f32 %v952_v56 }
 0x424   :  { %1816 = vtanh.f32 %v953_v6 }
 0x425   :  { %1818 = vtanh.f32 %v954_v57 }
 0x42c   :  { %v1813_v10 = vpop.eup %1812 }
 0x42d   :  { %v959_v11 = vadd.f32 1.0, %v1813_v10  ;;  %v1815_v1 = vpop.eup %1814 }
 0x42e   :  { %v961_v9 = vadd.f32 1.0, %v1815_v1  ;;  %v1817_v47 = vpop.eup %1816 }
 0x42f   :  { %v960_v7 = vmul.f32 0.5, %v959_v11  ;;  %v1819_v8 = vpop.eup %1818 }
 0x430   :  { %v962_v19 = vmul.f32 0.5, %v961_v9  ;;  %v963_v60 = vadd.f32 1.0, %v1819_v8  ;;  %v2539_v9 = vld [vmem:[#allocation6] ss:$16 sps:$4 sm:$0xff]   ;;  %v2559_v8 = vld [vmem:[#allocation6 + $0x44] ss:$16 sps:$4 sm:$0xff]  }
 0x431   :  { %v966_v29 = vmul.f32 %v1817_v47, %v960_v7  ;;  %v2542_v47 = vld [vmem:[#allocation6 + $0x8] ss:$16 sps:$4 sm:$0xff]  }
 0x432   :  { %v965_v45 = vmul.f32 %v962_v19, %v2436_v3  ;;  %v964_v38 = vmul.f32 0.5, %v963_v60  ;;  %v2545_v19 = vld [vmem:[#allocation6 + $0x24] ss:$16 sps:$4 sm:$0xff]   ;;  %v2562_v60 = vld [vmem:[#allocation6 + $0x4c] ss:$16 sps:$4 sm:$0xff]  }
 0x434   :  { %v2482_v4 = vadd.f32 %v966_v29, %v965_v45  ;;  %v2548_v29 = vld [vmem:[#allocation6 + $0x2c] ss:$16 sps:$4 sm:$0xff]   ;;  %v2553_v45 = vld [vmem:[#allocation6 + $0x20] ss:$16 sps:$4 sm:$0xff]  }
 0x436   :  { %1820 = vtanh.f32 %v2482_v4 }
 0x440   :  { %v1821_v63 = vpop.eup %1820 }
 0x441   :  { %v2485_v2 = vmul.f32 %v1821_v63, %v964_v38  ;;  %v2565_v38 = vld [vmem:[#allocation6 + $0x40] ss:$16 sps:$4 sm:$0xff]   ;;  %v2568_v63 = vld [vmem:[#allocation6 + $0x48] ss:$16 sps:$4 sm:$0xff]  }
 0x443   :  { %v974_v46 = vpack.c.bf16 %v2485_v2, %v2485_v2 }
 0x445   :  { %1008 = vmatmul.mubr.bf16.vlgmr.msra.gmra.mrb[32].mxu0 %v974_v46  ;;  %1049 = vmatmul.mubr.bf16.vlgmr.msra.gmra.mrb[32].mxu1 %v974_v46  ;;  %v2571_v46 = vld [vmem:[#allocation6 + $0x64] ss:$16 sps:$4 sm:$0xff]  }
 0x446   :  { %1082 = vmatpush1.bf16.msra.mxu0 %v2104_v12  ;;  %1123 = vmatpush1.bf16.msra.mxu1 %v2106_v13  ;;  %v2521_v12 = vld [vmem:[#allocation6 + $0x4] ss:$16 sps:$4 sm:$0xff]   ;;  %v2524_v13 = vld [vmem:[#allocation6 + $0xc] ss:$16 sps:$4 sm:$0xff]  }
 0x447   :  { %1083 = vmatprep.subr.bf16.mxu0 %v2109_v14  ;;  %1124 = vmatprep.subr.bf16.mxu1 %v2112_v15 }
 0x448   :  { %1113 = vmatprep.mubr.bf16.mxu0 %v2718_v48  ;;  %1154 = vmatprep.mubr.bf16.mxu1 %v2718_v48 }
 0x44a   :  { %1084 = vmatpush1.bf16.msra.mxu0 %v2116_v16  ;;  %1125 = vmatpush1.bf16.msra.mxu1 %v2120_v17  ;;  %v2723_v16 = vld [vmem:[#allocation17_spill] sm:$0xff] }
 0x44b   :  { %1085 = vmatprep.subr.bf16.mxu0 %v2124_v18  ;;  %1126 = vmatprep.subr.bf16.mxu1 %v2131_v20  ;;  %v2724_v18 = vld [vmem:[#allocation18_spill] sm:$0xff] }
 0x44e   :  { %1086 = vmatpush1.bf16.msra.mxu0 %v2133_v21  ;;  %1127 = vmatpush1.bf16.msra.mxu1 %v2137_v22 }
 0x44f   :  { %1087 = vmatprep.subr.bf16.mxu0 %v2141_v23  ;;  %1128 = vmatprep.subr.bf16.mxu1 %v2143_v24  ;;  %v2725_v23 = vld [vmem:[#allocation19_spill] sm:$0xff] }
 0x452   :  { %1088 = vmatpush1.bf16.msra.mxu0 %v2147_v25  ;;  %1129 = vmatpush1.bf16.msra.mxu1 %v2151_v26  ;;  %v2726_v25 = vld [vmem:[#allocation20_spill] sm:$0xff] }
 0x453   :  { %1089 = vmatprep.subr.bf16.mxu0 %v2155_v27  ;;  %1130 = vmatprep.subr.bf16.mxu1 %v2157_v28 }
 0x456   :  { %1090 = vmatpush1.bf16.msra.mxu0 %v2164_v30  ;;  %1131 = vmatpush1.bf16.msra.mxu1 %v2166_v31 }
 0x457   :  { %1091 = vmatprep.subr.bf16.mxu0 %v2170_v32  ;;  %1132 = vmatprep.subr.bf16.mxu1 %v2174_v33 }
 0x45a   :  { %1092 = vmatpush1.bf16.msra.mxu0 %v2178_v34  ;;  %1133 = vmatpush1.bf16.msra.mxu1 %v2180_v35 }
 0x45b   :  { %1093 = vmatprep.subr.bf16.mxu0 %v2184_v36  ;;  %1134 = vmatprep.subr.bf16.mxu1 %v2188_v37 }
 0x45e   :  { %1094 = vmatpush1.bf16.msra.mxu0 %v2195_v39  ;;  %1135 = vmatpush1.bf16.msra.mxu1 %v2197_v40 }
 0x45f   :  { %1095 = vmatprep.subr.bf16.mxu0 %v2199_v41  ;;  %1136 = vmatprep.subr.bf16.mxu1 %v2201_v42 }
 0x462   :  { %1096 = vmatpush1.bf16.msra.mxu0 %v2211_v43  ;;  %1137 = vmatpush1.bf16.msra.mxu1 %v2213_v44 }
 0x463   :  { %1187 = vmatprep.subr.bf16.mxu0 %v2521_v12  ;;  %1228 = vmatprep.subr.bf16.mxu1 %v2524_v13 }
 0x518   :  { %v1009_v14 = vpop.f32.mrb[32].mxu0  ;;  %v1050_v15 = vpop.f32.mrb[32].mxu1 }
 0x519   :  { %v1057_v17 = vadd.f32 %v1009_v14, %v2723_v16  ;;  %v1059_v20 = vadd.f32 %v1050_v15, %v2724_v18  ;;  %v1011_v21 = vpop.f32.mrb[33].mxu0  ;;  %v1052_v22 = vpop.f32.mrb[33].mxu1  ;;  %v2574_v14 = vld [vmem:[#allocation6 + $0x6c] ss:$16 sps:$4 sm:$0xff]   ;;  %v2577_v15 = vld [vmem:[#allocation6 + $0x60] ss:$16 sps:$4 sm:$0xff]  }
 0x51a   :  { %v1058_v24 = vadd.f32 %v1011_v21, %v2725_v23  ;;  %v1060_v26 = vadd.f32 %v1052_v22, %v2726_v25  ;;  %v1013_v27 = vpop.f32.mrb[34].mxu0  ;;  %v1054_v28 = vpop.f32.mrb[34].mxu1  ;;  %v2580_v16 = vld [vmem:[#allocation6 + $0x68] ss:$16 sps:$4 sm:$0xff]   ;;  %v2586_v18 = vld [vmem:[#allocation6 + $0x8c] ss:$16 sps:$4 sm:$0xff]  }
 0x51b   :  { %1822 = vtanh.f32 %v1057_v17  ;;  %v1014_v3 = vpop.f32.mrb[35].mxu0  ;;  %v1055_v50 = vpop.f32.mrb[35].mxu1  ;;  %v2583_v17 = vld [vmem:[#allocation6 + $0x84] ss:$16 sps:$4 sm:$0xff]  }
 0x51c   :  { %1824 = vtanh.f32 %v1058_v24 }
 0x51d   :  { %1826 = vtanh.f32 %v1059_v20 }
 0x51e   :  { %1828 = vtanh.f32 %v1060_v26 }
 0x525   :  { %v1823_v61 = vpop.eup %1822 }
 0x526   :  { %v1065_v6 = vadd.f32 1.0, %v1823_v61  ;;  %v1825_v53 = vpop.eup %1824 }
 0x527   :  { %v1067_v54 = vadd.f32 1.0, %v1825_v53  ;;  %v1827_v56 = vpop.eup %1826 }
 0x528   :  { %v1066_v52 = vmul.f32 0.5, %v1065_v6  ;;  %v1829_v59 = vpop.eup %1828 }
 0x529   :  { %v1068_v55 = vmul.f32 0.5, %v1067_v54  ;;  %v1069_v62 = vadd.f32 1.0, %v1829_v59  ;;  %v1904_v59 = vld [vmem:[#allocation6 + $0xc4] ss:$16 sps:$4 sm:$0xff]  }
 0x52a   :  { %v1072_v57 = vmul.f32 %v1827_v56, %v1066_v52  ;;  %v1899_v56 = vld [vmem:[#allocation6 + $0x88] ss:$16 sps:$4 sm:$0xff]  }
 0x52b   :  { %v1071_v58 = vmul.f32 %v1068_v55, %v2482_v4  ;;  %v1070_v10 = vmul.f32 0.5, %v1069_v62  ;;  %v2556_v4 = vld [vmem:[#allocation6 + $0x28] ss:$16 sps:$4 sm:$0xff]   ;;  %v1900_v55 = vld [vmem:[#allocation6 + $0xa4] ss:$16 sps:$4 sm:$0xff]  }
 0x52c   :  { %v1905_v62 = vld [vmem:[#allocation6 + $0xcc] ss:$16 sps:$4 sm:$0xff]  }
 0x52d   :  { %v2532_v0 = vadd.f32 %v1072_v57, %v1071_v58  ;;  %v1901_v57 = vld [vmem:[#allocation6 + $0xac] ss:$16 sps:$4 sm:$0xff]   ;;  %v1902_v58 = vld [vmem:[#allocation6 + $0xa0] ss:$16 sps:$4 sm:$0xff]  }
 0x52f   :  { %1830 = vtanh.f32 %v2532_v0 }
 0x539   :  { %v1831_v11 = vpop.eup %1830 }
 0x53a   :  { %v2535_v1 = vmul.f32 %v1831_v11, %v1070_v10  ;;  %v1906_v10 = vld [vmem:[#allocation6 + $0xc0] ss:$16 sps:$4 sm:$0xff]   ;;  %v1907_v11 = vld [vmem:[#allocation6 + $0xc8] ss:$16 sps:$4 sm:$0xff]  }
 0x53c   :  { %v1080_v7 = vpack.c.bf16 %v2535_v1, %v2535_v1 }
 0x53e   :  { %1114 = vmatmul.mubr.bf16.vlgmr.msra.gmra.mrb[36].mxu0 %v1080_v7  ;;  %1155 = vmatmul.mubr.bf16.vlgmr.msra.gmra.mrb[36].mxu1 %v1080_v7  ;;  %v1908_v7 = vld [vmem:[#allocation6 + $0xe4] ss:$16 sps:$4 sm:$0xff]  }
 0x53f   :  { %1188 = vmatpush1.bf16.msra.mxu0 %v2539_v9  ;;  %1229 = vmatpush1.bf16.msra.mxu1 %v2542_v47 }
 0x540   :  { %1189 = vmatprep.subr.bf16.mxu0 %v2545_v19  ;;  %1230 = vmatprep.subr.bf16.mxu1 %v2548_v29 }
 0x541   :  { %1219 = vmatprep.mubr.bf16.mxu0 %v2718_v48  ;;  %1260 = vmatprep.mubr.bf16.mxu1 %v2718_v48 }
 0x543   :  { %1190 = vmatpush1.bf16.msra.mxu0 %v2553_v45  ;;  %1231 = vmatpush1.bf16.msra.mxu1 %v2556_v4 }
 0x544   :  { %1191 = vmatprep.subr.bf16.mxu0 %v2559_v8  ;;  %1232 = vmatprep.subr.bf16.mxu1 %v2562_v60 }
 0x547   :  { %1192 = vmatpush1.bf16.msra.mxu0 %v2565_v38  ;;  %1233 = vmatpush1.bf16.msra.mxu1 %v2568_v63 }
 0x548   :  { %1193 = vmatprep.subr.bf16.mxu0 %v2571_v46  ;;  %1234 = vmatprep.subr.bf16.mxu1 %v2574_v14 }
 0x54b   :  { %1194 = vmatpush1.bf16.msra.mxu0 %v2577_v15  ;;  %1235 = vmatpush1.bf16.msra.mxu1 %v2580_v16 }
 0x54c   :  { %1195 = vmatprep.subr.bf16.mxu0 %v2583_v17  ;;  %1236 = vmatprep.subr.bf16.mxu1 %v2586_v18 }
 0x54f   :  { %1196 = vmatpush1.bf16.msra.mxu0 %v2164_v30  ;;  %1237 = vmatpush1.bf16.msra.mxu1 %v2166_v31 }
 0x550   :  { %1197 = vmatprep.subr.bf16.mxu0 %v2170_v32  ;;  %1238 = vmatprep.subr.bf16.mxu1 %v2174_v33  ;;  %v2727_v32 = vld [vmem:[#allocation21_spill] sm:$0xff] }
 0x553   :  { %1198 = vmatpush1.bf16.msra.mxu0 %v2178_v34  ;;  %1239 = vmatpush1.bf16.msra.mxu1 %v2180_v35  ;;  %v2728_v34 = vld [vmem:[#allocation22_spill] sm:$0xff] }
 0x554   :  { %1199 = vmatprep.subr.bf16.mxu0 %v2184_v36  ;;  %1240 = vmatprep.subr.bf16.mxu1 %v2188_v37 }
 0x557   :  { %1200 = vmatpush1.bf16.msra.mxu0 %v2195_v39  ;;  %1241 = vmatpush1.bf16.msra.mxu1 %v2197_v40  ;;  %v2729_v39 = vld [vmem:[#allocation23_spill] sm:$0xff] }
 0x558   :  { %1201 = vmatprep.subr.bf16.mxu0 %v2199_v41  ;;  %1242 = vmatprep.subr.bf16.mxu1 %v2201_v42  ;;  %v2730_v41 = vld [vmem:[#allocation24_spill] sm:$0xff] }
 0x55b   :  { %1202 = vmatpush1.bf16.msra.mxu0 %v2211_v43  ;;  %1243 = vmatpush1.bf16.msra.mxu1 %v2213_v44 }
 0x55c   :  { %1293 = vmatprep.subr.bf16.mxu0 %v2521_v12  ;;  %1334 = vmatprep.subr.bf16.mxu1 %v2524_v13 }
 0x611   :  { %v1115_v30 = vpop.f32.mrb[36].mxu0  ;;  %v1156_v31 = vpop.f32.mrb[36].mxu1 }
 0x612   :  { %v1163_v33 = vadd.f32 %v1115_v30, %v2727_v32  ;;  %v1165_v35 = vadd.f32 %v1156_v31, %v2728_v34  ;;  %v1117_v36 = vpop.f32.mrb[37].mxu0  ;;  %v1158_v37 = vpop.f32.mrb[37].mxu1 }
 0x613   :  { %v1164_v40 = vadd.f32 %v1117_v36, %v2729_v39  ;;  %v1166_v42 = vadd.f32 %v1158_v37, %v2730_v41  ;;  %v1119_v20 = vpop.f32.mrb[38].mxu0  ;;  %v1160_v43 = vpop.f32.mrb[38].mxu1 }
 0x614   :  { %1832 = vtanh.f32 %v1163_v33  ;;  %v1120_v44 = vpop.f32.mrb[39].mxu0  ;;  %v1161_v21 = vpop.f32.mrb[39].mxu1 }
 0x615   :  { %1834 = vtanh.f32 %v1164_v40 }
 0x616   :  { %1836 = vtanh.f32 %v1165_v35 }
 0x617   :  { %1838 = vtanh.f32 %v1166_v42 }
 0x61e   :  { %v1833_v12 = vpop.eup %1832 }
 0x61f   :  { %v1171_v13 = vadd.f32 1.0, %v1833_v12  ;;  %v1835_v22 = vpop.eup %1834 }
 0x620   :  { %v1173_v24 = vadd.f32 1.0, %v1835_v22  ;;  %v1837_v25 = vpop.eup %1836 }
 0x621   :  { %v1172_v23 = vmul.f32 0.5, %v1171_v13  ;;  %v1839_v50 = vpop.eup %1838 }
 0x622   :  { %v1174_v26 = vmul.f32 0.5, %v1173_v24  ;;  %v1175_v61 = vadd.f32 1.0, %v1839_v50 }
 0x623   :  { %v1178_v27 = vmul.f32 %v1837_v25, %v1172_v23  ;;  %v2735_v25 = vld [vmem:[#allocation29_spill] sm:$0xff] }
 0x624   :  { %v1177_v28 = vmul.f32 %v1174_v26, %v2532_v0  ;;  %v1176_v6 = vmul.f32 0.5, %v1175_v61  ;;  %v1903_v0 = vld [vmem:[#allocation6 + $0xa8] ss:$16 sps:$4 sm:$0xff]  }
 0x625   :  { %v2737_v61 = vld [vmem:[#allocation31_spill] sm:$0xff] }
 0x626   :  { %v2610_v3 = vadd.f32 %v1178_v27, %v1177_v28  ;;  %v2736_v27 = vld [vmem:[#allocation30_spill] sm:$0xff] }
 0x628   :  { %1840 = vtanh.f32 %v2610_v3 }
 0x632   :  { %v1841_v53 = vpop.eup %1840 }
 0x633   :  { %v2613_v52 = vmul.f32 %v1841_v53, %v1176_v6  ;;  %v2738_v53 = vld [vmem:[#allocation32_spill] sm:$0xff] }
 0x635   :  { %v1186_v54 = vpack.c.bf16 %v2613_v52, %v2613_v52 }
 0x637   :  { %1220 = vmatmul.mubr.bf16.vlgmr.msra.gmra.mrb[40].mxu0 %v1186_v54  ;;  %1261 = vmatmul.mubr.bf16.vlgmr.msra.gmra.mrb[40].mxu1 %v1186_v54 }
 0x638   :  { %1294 = vmatpush1.bf16.msra.mxu0 %v2539_v9  ;;  %1335 = vmatpush1.bf16.msra.mxu1 %v2542_v47  ;;  %v1909_v9 = vld [vmem:[#allocation6 + $0xec] ss:$16 sps:$4 sm:$0xff]   ;;  %v1910_v47 = vld [vmem:[#allocation6 + $0xe0] ss:$16 sps:$4 sm:$0xff]  }
 0x639   :  { %1295 = vmatprep.subr.bf16.mxu0 %v2545_v19  ;;  %1336 = vmatprep.subr.bf16.mxu1 %v2548_v29  ;;  %v1911_v19 = vld [vmem:[#allocation6 + $0xe8] ss:$16 sps:$4 sm:$0xff]  }
 0x63a   :  { %1325 = vmatprep.mubr.bf16.mxu0 %v2718_v48  ;;  %1366 = vmatprep.mubr.bf16.mxu1 %v2718_v48  ;;  %v1898_v48 = vld [vmem:[#allocation6 + $0x80] ss:$16 sps:$4 sm:$0xff]  }
 0x63c   :  { %1296 = vmatpush1.bf16.msra.mxu0 %v2553_v45  ;;  %1337 = vmatpush1.bf16.msra.mxu1 %v2556_v4  ;;  %v2731_v4 = vld [vmem:[#allocation25_spill] sm:$0xff] }
 0x63d   :  { %1297 = vmatprep.subr.bf16.mxu0 %v2559_v8  ;;  %1338 = vmatprep.subr.bf16.mxu1 %v2562_v60  ;;  %v2732_v60 = vld [vmem:[#allocation26_spill] sm:$0xff] }
 0x640   :  { %1298 = vmatpush1.bf16.msra.mxu0 %v2565_v38  ;;  %1339 = vmatpush1.bf16.msra.mxu1 %v2568_v63 }
 0x641   :  { %1299 = vmatprep.subr.bf16.mxu0 %v2571_v46  ;;  %1340 = vmatprep.subr.bf16.mxu1 %v2574_v14  ;;  %v2733_v14 = vld [vmem:[#allocation27_spill] sm:$0xff] }
 0x644   :  { %1300 = vmatpush1.bf16.msra.mxu0 %v2577_v15  ;;  %1341 = vmatpush1.bf16.msra.mxu1 %v2580_v16  ;;  %v2734_v16 = vld [vmem:[#allocation28_spill] sm:$0xff] }
 0x645   :  { %1301 = vmatprep.subr.bf16.mxu0 %v2583_v17  ;;  %1342 = vmatprep.subr.bf16.mxu1 %v2586_v18 }
 0x648   :  { %1302 = vmatpush1.bf16.msra.mxu0 %v1898_v48  ;;  %1343 = vmatpush1.bf16.msra.mxu1 %v1899_v56 }
 0x649   :  { %1303 = vmatprep.subr.bf16.mxu0 %v1900_v55  ;;  %1344 = vmatprep.subr.bf16.mxu1 %v1901_v57 }
 0x64c   :  { %1304 = vmatpush1.bf16.msra.mxu0 %v1902_v58  ;;  %1345 = vmatpush1.bf16.msra.mxu1 %v1903_v0 }
 0x64d   :  { %1305 = vmatprep.subr.bf16.mxu0 %v1904_v59  ;;  %1346 = vmatprep.subr.bf16.mxu1 %v1905_v62 }
 0x650   :  { %1306 = vmatpush1.bf16.msra.mxu0 %v1906_v10  ;;  %1347 = vmatpush1.bf16.msra.mxu1 %v1907_v11 }
 0x651   :  { %1307 = vmatprep.subr.bf16.mxu0 %v1908_v7  ;;  %1348 = vmatprep.subr.bf16.mxu1 %v1909_v9 }
 0x654   :  { %1308 = vmatpush1.bf16.msra.mxu0 %v1910_v47  ;;  %1349 = vmatpush1.bf16.msra.mxu1 %v1911_v19 }
 0x70a   :  { %v1221_v29 = vpop.f32.mrb[40].mxu0  ;;  %v1262_v45 = vpop.f32.mrb[40].mxu1 }
 0x70b   :  { %v1269_v8 = vadd.f32 %v1221_v29, %v2731_v4  ;;  %v1271_v38 = vadd.f32 %v1262_v45, %v2732_v60  ;;  %v1223_v63 = vpop.f32.mrb[41].mxu0  ;;  %v1264_v46 = vpop.f32.mrb[41].mxu1 }
 0x70c   :  { %v1270_v15 = vadd.f32 %v1223_v63, %v2733_v14  ;;  %v1272_v17 = vadd.f32 %v1264_v46, %v2734_v16  ;;  %v1225_v18 = vpop.f32.mrb[42].mxu0  ;;  %v1266_v30 = vpop.f32.mrb[42].mxu1 }
 0x70d   :  { %1842 = vtanh.f32 %v1269_v8  ;;  %v1226_v31 = vpop.f32.mrb[43].mxu0  ;;  %v1267_v32 = vpop.f32.mrb[43].mxu1  ;;  %v1774_v30 = vld [vmem:[#allocation8] sm:$0xff]  }
 0x70e   :  { %1844 = vtanh.f32 %v1270_v15  ;;  %v2014_v31 = vmov 0.0   ;;  %v1775_v32 = vld [vmem:[#allocation8 + $0x8] sm:$0xff]  }
 0x70f   :  { %1846 = vtanh.f32 %v1271_v38  ;;  %1679 = vmatprep.subr.bf16.mxu0 %v2014_v31 }
 0x710   :  { %1848 = vtanh.f32 %v1272_v17 }
 0x717   :  { %v1843_v33 = vpop.eup %1842 }
 0x718   :  { %v1277_v34 = vadd.f32 1.0, %v1843_v33  ;;  %v1845_v35 = vpop.eup %1844  ;;  %v1776_v33 = vld [vmem:[#allocation8 + $0x10] sm:$0xff]  }
 0x719   :  { %v1279_v37 = vadd.f32 1.0, %v1845_v35  ;;  %v1847_v39 = vpop.eup %1846  ;;  %v1778_v35 = vld [vmem:[#allocation8 + $0x20] sm:$0xff]  }
 0x71a   :  { %v1278_v36 = vmul.f32 0.5, %v1277_v34  ;;  %v1849_v43 = vpop.eup %1848  ;;  %v1777_v34 = vld [vmem:[#allocation8 + $0x18] sm:$0xff]  }
 0x71b   :  { %v1280_v40 = vmul.f32 0.5, %v1279_v37  ;;  %v1281_v44 = vadd.f32 1.0, %v1849_v43  ;;  %v1780_v37 = vld [vmem:[#allocation8 + $0x30] sm:$0xff]  }
 0x71c   :  { %v1284_v41 = vmul.f32 %v1847_v39, %v1278_v36  ;;  %v1779_v36 = vld [vmem:[#allocation8 + $0x28] sm:$0xff]   ;;  %v1781_v39 = vld [vmem:[#allocation8 + $0x38] sm:$0xff]  }
 0x71d   :  { %v1283_v42 = vmul.f32 %v1280_v40, %v2610_v3  ;;  %v1282_v21 = vmul.f32 0.5, %v1281_v44 }
 0x71f   :  { %v1285_v20 = vadd.f32 %v1284_v41, %v1283_v42 }
 0x721   :  { %1850 = vtanh.f32 %v1285_v20 }
 0x72b   :  { %v1851_v12 = vpop.eup %1850 }
 0x72c   :  { %v2640_v13 = vmul.f32 %v1851_v12, %v1282_v21 }
 0x72e   :  { %v1292_v22 = vpack.c.bf16 %v2640_v13, %v2640_v13 }
 0x730   :  { %1326 = vmatmul.mubr.bf16.vlgmr.msra.gmra.mrb[44].mxu0 %v1292_v22  ;;  %1367 = vmatmul.mubr.bf16.vlgmr.msra.gmra.mrb[44].mxu1 %v1292_v22 }
 0x731   :  { %1680 = vmatpush3.bf16.msra.mxu0 %v1774_v30  ;;  %1695 = vmatprep.mubr.msk.bf16.mxu0 %vm2015_vm1, %v2014_v31 }
 0x732   :  { %1681 = vmatprep.subr.bf16.mxu0 %v2014_v31 }
 0x735   :  { %1682 = vmatpush3.bf16.msra.mxu0 %v1775_v32 }
 0x736   :  { %1683 = vmatprep.subr.bf16.mxu0 %v2014_v31 }
 0x739   :  { %1684 = vmatpush3.bf16.msra.mxu0 %v1776_v33 }
 0x73a   :  { %1685 = vmatprep.subr.bf16.mxu0 %v2014_v31 }
 0x73d   :  { %1686 = vmatpush3.bf16.msra.mxu0 %v1777_v34 }
 0x73e   :  { %1687 = vmatprep.subr.bf16.mxu0 %v2014_v31 }
 0x741   :  { %1688 = vmatpush3.bf16.msra.mxu0 %v1778_v35 }
 0x742   :  { %1689 = vmatprep.subr.bf16.mxu0 %v2014_v31 }
 0x745   :  { %1690 = vmatpush3.bf16.msra.mxu0 %v1779_v36 }
 0x746   :  { %1691 = vmatprep.subr.bf16.mxu0 %v2014_v31 }
 0x749   :  { %1692 = vmatpush3.bf16.msra.mxu0 %v1780_v37 }
 0x74a   :  { %1693 = vmatprep.subr.bf16.mxu0 %v2014_v31 }
 0x74d   :  { %1694 = vmatpush3.bf16.msra.mxu0 %v1781_v39 }
 0x803   :  { %v1327_v23 = vpop.f32.mrb[44].mxu0  ;;  %v1368_v24 = vpop.f32.mrb[44].mxu1 }
 0x804   :  { %v1375_v26 = vadd.f32 %v1327_v23, %v2735_v25  ;;  %v1377_v28 = vadd.f32 %v1368_v24, %v2736_v27  ;;  %v1329_v3 = vpop.f32.mrb[45].mxu0  ;;  %v1370_v50 = vpop.f32.mrb[45].mxu1 }
 0x805   :  { %v1376_v6 = vadd.f32 %v1329_v3, %v2737_v61  ;;  %v1378_v54 = vadd.f32 %v1370_v50, %v2738_v53  ;;  %v1331_v48 = vpop.f32.mrb[46].mxu0  ;;  %v1372_v56 = vpop.f32.mrb[46].mxu1 }
 0x806   :  { %1852 = vtanh.f32 %v1375_v26  ;;  %v1332_v55 = vpop.f32.mrb[47].mxu0  ;;  %v1373_v57 = vpop.f32.mrb[47].mxu1 }
 0x807   :  { %1854 = vtanh.f32 %v1376_v6 }
 0x808   :  { %1856 = vtanh.f32 %v1377_v28 }
 0x809   :  { %1858 = vtanh.f32 %v1378_v54 }
 0x810   :  { %v1853_v58 = vpop.eup %1852 }
 0x811   :  { %v1383_v0 = vadd.f32 1.0, %v1853_v58  ;;  %v1855_v59 = vpop.eup %1854 }
 0x812   :  { %v1385_v10 = vadd.f32 1.0, %v1855_v59  ;;  %v1857_v11 = vpop.eup %1856 }
 0x813   :  { %v1384_v62 = vmul.f32 0.5, %v1383_v0  ;;  %v1859_v29 = vpop.eup %1858 }
 0x814   :  { %v1386_v7 = vmul.f32 0.5, %v1385_v10  ;;  %v1387_v45 = vadd.f32 1.0, %v1859_v29 }
 0x815   :  { %v1390_v9 = vmul.f32 %v1857_v11, %v1384_v62 }
 0x816   :  { %v1389_v47 = vmul.f32 %v1386_v7, %v1285_v20  ;;  %v1388_v4 = vmul.f32 0.5, %v1387_v45 }
 0x818   :  { %v1391_v19 = vadd.f32 %v1390_v9, %v1389_v47 }
 0x81a   :  { %1860 = vtanh.f32 %v1391_v19 }
 0x824   :  { %v1861_v8 = vpop.eup %1860 }
 0x825   :  { %v2648_v60 = vmul.f32 %v1861_v8, %v1388_v4 }
 0x827   :  { %v1400_v38 = vmul.f32 %v2648_v60, %v2439_v5  ;;  %v1394_v63 = vmul.f32 %v2648_v60, %v2347_v49  ;;  %v1403_v46 = vmul.f32 %v2648_v60, %v2485_v2  ;;  %v1397_v14 = vmul.f32 %v2648_v60, %v2393_v51 }
 0x828   :  { %v1409_v15 = vmul.f32 %v2648_v60, %v2613_v52  ;;  %v1406_v16 = vmul.f32 %v2648_v60, %v2535_v1  ;;  %v1415_v17 = vmul.f32 %v2648_v60, %v2648_v60  ;;  %v1412_v18 = vmul.f32 %v2648_v60, %v2640_v13 }
 0x829   :  { %1401 = vadd.xlane.f32.xlu1 %v1400_v38  ;;  %1395 = vadd.xlane.f32.xlu0 %v1394_v63 }
 0x82d   :  { %1404 = vadd.xlane.f32.xlu1 %v1403_v46  ;;  %1398 = vadd.xlane.f32.xlu0 %v1397_v14 }
 0x831   :  { %1410 = vadd.xlane.f32.xlu1 %v1409_v15  ;;  %1407 = vadd.xlane.f32.xlu0 %v1406_v16 }
 0x835   :  { %1416 = vadd.xlane.f32.xlu1 %v1415_v17  ;;  %1413 = vadd.xlane.f32.xlu0 %v1412_v18 }
 0x8b6   :  { %v1402_v40 = vpop.xlane.xlu1 %1401  ;;  %v1396_v41 = vpop.xlane.xlu0 %1395 }
 0x8ba   :  { %v1405_v42 = vpop.xlane.xlu1 %1404  ;;  %v1399_v20 = vpop.xlane.xlu0 %1398 }
 0x8bb   :  { %v1418_v43 = vmax.f32 %v1396_v41, %v1399_v20 }
 0x8bd   :  { %v1419_v44 = vmax.f32 %v1418_v43, %v1402_v40 }
 0x8be   :  { %v1408_v21 = vpop.xlane.xlu0 %1407  ;;  %v1411_v22 = vpop.xlane.xlu1 %1410 }
 0x8bf   :  { %v1420_v12 = vmax.f32 %v1419_v44, %v1405_v42 }
 0x8c1   :  { %v1421_v23 = vmax.f32 %v1420_v12, %v1408_v21 }
 0x8c2   :  { %v1414_v25 = vpop.xlane.xlu0 %1413  ;;  %v1417_v27 = vpop.xlane.xlu1 %1416 }
 0x8c3   :  { %v1422_v24 = vmax.f32 %v1421_v23, %v1411_v22 }
 0x8c5   :  { %v1423_v26 = vmax.f32 %v1422_v24, %v1414_v25 }
 0x8c7   :  { %v1424_v28 = vmax.f32 %v1423_v26, %v1417_v27 }
 0x8c9   :  { %v1425_v3 = vsub.f32 %v1396_v41, %v1424_v28  ;;  %v1428_v50 = vsub.f32 %v1399_v20, %v1424_v28  ;;  %v1431_v61 = vsub.f32 %v1402_v40, %v1424_v28  ;;  %v1434_v6 = vsub.f32 %v1405_v42, %v1424_v28 }
 0x8ca   :  { %v1437_v56 = vsub.f32 %v1408_v21, %v1424_v28  ;;  %v1440_v57 = vsub.f32 %v1411_v22, %v1424_v28  ;;  %v1443_v0 = vsub.f32 %v1414_v25, %v1424_v28  ;;  %v1446_v62 = vsub.f32 %v1417_v27, %v1424_v28 }
 0x8cb   :  { %v1426_v53 = vmul.f32 1.442695, %v1425_v3  ;;  %v1429_v54 = vmul.f32 1.442695, %v1428_v50  ;;  %v1432_v48 = vmul.f32 1.442695, %v1431_v61 }
 0x8cc   :  { %v1435_v55 = vmul.f32 1.442695, %v1434_v6  ;;  %v1438_v58 = vmul.f32 1.442695, %v1437_v56  ;;  %v1441_v59 = vmul.f32 1.442695, %v1440_v57 }
 0x8cd   :  { %1862 = vpow2.f32 %v1426_v53  ;;  %v1444_v10 = vmul.f32 1.442695, %v1443_v0  ;;  %v1447_v11 = vmul.f32 1.442695, %v1446_v62 }
 0x8ce   :  { %1864 = vpow2.f32 %v1429_v54 }
 0x8cf   :  { %1866 = vpow2.f32 %v1432_v48 }
 0x8d0   :  { %1868 = vpow2.f32 %v1435_v55 }
 0x8d1   :  { %1870 = vpow2.f32 %v1438_v58 }
 0x8d2   :  { %1872 = vpow2.f32 %v1441_v59 }
 0x8d3   :  { %1874 = vpow2.f32 %v1444_v10 }
 0x8d4   :  { %1876 = vpow2.f32 %v1447_v11 }
 0x8d7   :  { %v1863_v7 = vpop.eup %1862 }
 0x8d8   :  { %v1865_v9 = vpop.eup %1864 }
 0x8d9   :  { %v1449_v47 = vadd.f32 %v1865_v9, %v1863_v7  ;;  %v1867_v19 = vpop.eup %1866 }
 0x8da   :  { %v1869_v45 = vpop.eup %1868 }
 0x8db   :  { %v1450_v29 = vadd.f32 %v1867_v19, %v1449_v47  ;;  %v1871_v8 = vpop.eup %1870 }
 0x8dc   :  { %v1873_v63 = vpop.eup %1872 }
 0x8dd   :  { %v1451_v4 = vadd.f32 %v1869_v45, %v1450_v29  ;;  %v1875_v14 = vpop.eup %1874 }
 0x8de   :  { %v1877_v16 = vpop.eup %1876 }
 0x8df   :  { %v1452_v38 = vadd.f32 %v1871_v8, %v1451_v4 }
 0x8e1   :  { %v1453_v46 = vadd.f32 %v1873_v63, %v1452_v38 }
 0x8e3   :  { %v1454_v15 = vadd.f32 %v1875_v14, %v1453_v46 }
 0x8e5   :  { %v1455_v17 = vadd.f32 %v1877_v16, %v1454_v15 }
 0x8e7   :  { %1878 = vrcp.f32 %v1455_v17 }
 0x8f1   :  { %v1879_v18 = vpop.eup %1878 }
 0x8f2   :  { %v1457_v30 = vmul.f32 %v1879_v18, %v1863_v7  ;;  %v1459_v31 = vmul.f32 %v1879_v18, %v1865_v9  ;;  %v1462_v32 = vmul.f32 %v1879_v18, %v1867_v19  ;;  %v1465_v35 = vmul.f32 %v1879_v18, %v1869_v45 }
 0x8f3   :  { %v1468_v39 = vmul.f32 %v1879_v18, %v1871_v8  ;;  %v1471_v42 = vmul.f32 %v1879_v18, %v1873_v63  ;;  %v1474_v20 = vmul.f32 %v1879_v18, %v1875_v14  ;;  %v1477_v22 = vmul.f32 %v1879_v18, %v1877_v16 }
 0x8f4   :  { %v1458_v33 = vmul.f32 %v1457_v30, %v2347_v49  ;;  %v1460_v34 = vmul.f32 %v1459_v31, %v2393_v51  ;;  %v1463_v37 = vmul.f32 %v1462_v32, %v2439_v5  ;;  %v1466_v41 = vmul.f32 %v1465_v35, %v2485_v2  ;;  %v1661_v2 = vld [vmem:[%s2694_s5] ss:$0 sm:$0xff] }
 0x8f5   :  { %v1469_v44 = vmul.f32 %v1468_v39, %v2535_v1  ;;  %v1472_v12 = vmul.f32 %v1471_v42, %v2613_v52  ;;  %v1475_v51 = vmul.f32 %v1474_v20, %v2640_v13  ;;  %v1478_v24 = vmul.f32 %v1477_v22, %v2648_v60 }
 0x8f6   :  { %v1461_v36 = vadd.f32 %v1460_v34, %v1458_v33 }
 0x8f8   :  { %v1464_v40 = vadd.f32 %v1463_v37, %v1461_v36 }
 0x8fa   :  { %v1467_v43 = vadd.f32 %v1466_v41, %v1464_v40 }
 0x8fc   :  { %v1470_v21 = vadd.f32 %v1469_v44, %v1467_v43 }
 0x8fe   :  { %v1473_v49 = vadd.f32 %v1472_v12, %v1470_v21 }
 0x900   :  { %v1476_v23 = vadd.f32 %v1475_v51, %v1473_v49 }
 0x902   :  { %v1479_v5 = vadd.f32 %v1478_v24, %v1476_v23 }
 0x904   :  { %v1480_v25 = vpack.c.bf16 %v1479_v5, %v1479_v5 }
 0x906   :  { %1696 = vmatmul.mubr.bf16.vlgmr.msra.gmra.mrb[48].mxu0 %v1480_v25 }
 0x9d9   :  { %v1586_v1 = vpop.f32.mrb[48].mxu0 }
 0x9da   :  { %v1587_v26 = vadd.f32 %v1661_v2, %v1586_v1  ;;  %v1697_v27 = vpop.f32.mrb[49].mxu0 }
 0x9db   :  { %v1589_v52 = vpop.f32.mrb[50].mxu0 }
 0x9dc   :  { %1592 = vst [vmem:[#allocation9] sm:$0xff] %v1587_v26  ;;  %v1698_v28 = vpop.f32.mrb[51].mxu0 }
 0x9dd   :  { %1989 = shalt.err (!%p1986_p0)
}
 0x9de   :  { %s1990_s5 = scalar_lea.hbm %s2695_s6, 128 }
 0x9df   :  { %p1991_p1 = scmp.ne.s32.totalorder %s2695_s6, %s1990_s5  ;;  %p1994_p2 = scmp.lt.u32.totalorder %s1990_s5, %s2695_s6 }
 0x9e1   :  { %p1996_p3 = pnand %p1994_p2, %p1991_p1 }
 0x9e3   :  { %1999 = shalt.err (!%p1996_p3)
}
 0x9e4   :  { %1602 = dma.vmem_to_hbm [thread:$0]  %s1600_s2, 128, %s2695_s6, [#allocation5]  }
 0x9e5   :  { %2004 = dma.done.wait [#allocation5], 128  }
 0x9e6   :  { %2005 = vsyncadd [#allocation5], 4294967168 }
 0x9e7   :  { %1606 = vsyncpa [#allocation4], 1 }
 0x9e8   :  { %1607 = vsyncpa [#allocation7], 1 }
 0x9e9   :  { %1608 = vsyncpa [#allocation5], 1 }

</bundles_post_ra>
